<compile_context>
chip_gen: v6e
topology: v6e:2x2x1
jax: 0.10.0
libtpu: 0.0.40
codegen_flags: <defaults>
</compile_context>

<pallas_src>
import jax
import jax.numpy as jnp
from jax.experimental import pallas as pl
from jax.experimental.pallas import tpu as pltpu

LRELU_SLOPE = 0.2
BN_EPS = 1e-5
KSIZE = 4


# ----------------------------- Pallas kernels ------------------------------ #
def _lrelu(x):
    return jnp.where(x >= 0, x, LRELU_SLOPE * x)


def _conv_bias_lrelu_kernel(w_ref, p_ref, b_ref, o_ref):
    # (Cout, K) @ (K, M): bf16 operands, f32 accumulate; pixel axis M on lanes
    # -> lane-dense bf16 store for the next layer.
    z = jnp.dot(w_ref[...], p_ref[...], preferred_element_type=jnp.float32)
    o_ref[...] = _lrelu(z + b_ref[...]).astype(o_ref.dtype)


def _conv_bn_lrelu_kernel(w_ref, p_ref, g_ref, bt_ref, o_ref):
    # Fused conv GEMM + training-mode BatchNorm + LeakyReLU. The whole (Cout, M)
    # tile is resident, so the stats are exact and centered (no E[x^2]-E[x]^2).
    z = jnp.dot(w_ref[...], p_ref[...], preferred_element_type=jnp.float32)
    mean = jnp.mean(z, axis=1, keepdims=True)
    zc = z - mean
    var = jnp.mean(zc * zc, axis=1, keepdims=True)
    y = zc * (jax.lax.rsqrt(var + BN_EPS) * g_ref[...]) + bt_ref[...]
    o_ref[...] = _lrelu(y).astype(o_ref.dtype)


def _conv_bn_lrelu_head_kernel(w_ref, p_ref, g_ref, bt_ref, w5_ref, sel_ref,
                               b5_ref, o_ref):
    # Layer-4 conv + BN + LeakyReLU with the final 4x4 conv (Cout=1) + sigmoid
    # folded in: the layer-4 activation never leaves VMEM; only the (1, N)
    # per-image scores are written back.
    z = jnp.dot(w_ref[...], p_ref[...], preferred_element_type=jnp.float32)
    mean = jnp.mean(z, axis=1, keepdims=True)
    zc = z - mean
    var = jnp.mean(zc * zc, axis=1, keepdims=True)
    y = _lrelu(zc * (jax.lax.rsqrt(var + BN_EPS) * g_ref[...]) + bt_ref[...])
    # Head: round the activation through bf16 (same precision a bf16 HBM
    # hand-off would give), multiply by the per-image-tiled head weights (f32
    # products / accumulation), then reduce channels and per-image columns.
    yb = y.astype(jnp.bfloat16).astype(jnp.float32)
    prod = yb * w5_ref[...].astype(jnp.float32)                     # (C4, N*S)
    per_img = jnp.dot(prod, sel_ref[...],
                      preferred_element_type=jnp.float32)           # (C4, N)
    zhead = jnp.sum(per_img, axis=0, keepdims=True) + b5_ref[...]   # (1, N)
    o_ref[...] = jax.nn.sigmoid(zhead)


# ------------------------------- JAX glue ----------------------------------- #
def _single_block_call(kernel, out_shape, operands):
    # Everything fits in VMEM at these shapes: one grid step, full-array blocks
    # (legal under the full-dim exemption of the (8,128) rule). All operands and
    # outputs are 2-D.
    in_specs = [pl.BlockSpec(op.shape, lambda i: (0, 0)) for op in operands]
    return pl.pallas_call(
        kernel,
        out_shape=out_shape,
        grid=(1,),
        in_specs=in_specs,
        out_specs=pl.BlockSpec(out_shape.shape, lambda i: (0, 0)),
        compiler_params=pltpu.CompilerParams(dimension_semantics=("arbitrary",)),
    )(*operands)


def _weight_matrix(w):
    """torch weight [Cout, Cin, kh, kw] -> (Cout, kh*kw*Cin) bf16 (K order (kh,kw,cin))."""
    cout = w.shape[0]
    return jnp.transpose(w, (0, 2, 3, 1)).reshape(cout, -1).astype(jnp.bfloat16)


def _im2col_cmajor(h, ksize, stride, pad):
    """h: [C, N, H, W] (channel-major) -> patches [ksize*ksize*C, N*Ho*Wo].

    Row (K) order is (kh, kw, c) to match _weight_matrix; column order (n, ho, wo).
    """
    C, N, H, W = h.shape
    if pad:
        h = jnp.pad(h, ((0, 0), (0, 0), (pad, pad), (pad, pad)))
    Hp, Wp = H + 2 * pad, W + 2 * pad
    Ho = (Hp - ksize) // stride + 1
    Wo = (Wp - ksize) // stride + 1
    slabs = []
    for i in range(ksize):
        for j in range(ksize):
            slabs.append(h[:, :, i:i + stride * (Ho - 1) + 1:stride,
                               j:j + stride * (Wo - 1) + 1:stride])
    patches = jnp.stack(slabs, axis=0).reshape(ksize * ksize * C, N * Ho * Wo)
    return patches, Ho, Wo


def _conv_lrelu_layer(h, w, b, *, stride=2, pad=1):
    # h: [C, N, H, W] bf16 -> [Cout, N, Ho, Wo] bf16
    cout = w.shape[0]
    n = h.shape[1]
    patches, ho, wo = _im2col_cmajor(h, KSIZE, stride, pad)
    m = patches.shape[1]
    y = _single_block_call(
        _conv_bias_lrelu_kernel,
        jax.ShapeDtypeStruct((cout, m), jnp.bfloat16),
        [_weight_matrix(w), patches, b.reshape(cout, 1).astype(jnp.float32)],
    )
    return y.reshape(cout, n, ho, wo)


def _conv_bn_lrelu_layer(h, w, gamma, beta, *, stride=2, pad=1):
    # Conv bias before BatchNorm is exactly cancelled by the mean subtraction,
    # so the corresponding torch bias is intentionally unused on this path.
    cout = w.shape[0]
    n = h.shape[1]
    patches, ho, wo = _im2col_cmajor(h, KSIZE, stride, pad)
    m = patches.shape[1]
    y = _single_block_call(
        _conv_bn_lrelu_kernel,
        jax.ShapeDtypeStruct((cout, m), jnp.bfloat16),
        [_weight_matrix(w), patches,
         gamma.reshape(cout, 1).astype(jnp.float32),
         beta.reshape(cout, 1).astype(jnp.float32)],
    )
    return y.reshape(cout, n, ho, wo)


def _conv_bn_lrelu_head_layer(h, w, gamma, beta, w_head, b_head, *, stride=2, pad=1):
    # Layer 4 + folded head. Requires the layer-4 output spatial grid to equal
    # the head's 4x4 receptive field (i.e. 64x64 network input), so the head
    # output is 1x1 per image.
    cout = w.shape[0]
    n = h.shape[1]
    patches, ho, wo = _im2col_cmajor(h, KSIZE, stride, pad)
    assert (ho, wo) == (KSIZE, KSIZE), \
        "head fold expects a 4x4 layer-4 output (64x64 network input)"
    s = ho * wo
    # Head weight laid out to match the (n, ho, wo) column order, tiled per image.
    w_head_row = w_head.reshape(w_head.shape[1], s).astype(jnp.bfloat16)   # (C4, 16)
    w_head_tiled = jnp.tile(w_head_row, (1, n))                            # (C4, N*16)
    # Per-image column selector: sel[m, j] = 1 iff column m belongs to image j.
    sel = jnp.repeat(jnp.eye(n, dtype=jnp.float32), s, axis=0)             # (N*16, N)
    out = _single_block_call(
        _conv_bn_lrelu_head_kernel,
        jax.ShapeDtypeStruct((1, n), jnp.float32),
        [_weight_matrix(w), patches,
         gamma.reshape(cout, 1).astype(jnp.float32),
         beta.reshape(cout, 1).astype(jnp.float32),
         w_head_tiled, sel,
         b_head.reshape(1, 1).astype(jnp.float32)],
    )
    return out  # (1, N)


def discriminator_forward(x, params):
    # x: [N, C, H, W] (torch NCHW). One transpose to channel-major [C, N, H, W];
    # activations stay channel-major (pixel axis on lanes) through the network.
    n = x.shape[0]
    h = jnp.transpose(x, (1, 0, 2, 3)).astype(jnp.bfloat16)
    h = _conv_lrelu_layer(h, params["w1"], params["b1"])
    # b2/b3/b4 are intentionally unused: conv bias before training-mode BN cancels.
    h = _conv_bn_lrelu_layer(h, params["w2"], params["g2"], params["bt2"])
    h = _conv_bn_lrelu_layer(h, params["w3"], params["g3"], params["bt3"])
    scores = _conv_bn_lrelu_head_layer(h, params["w4"], params["g4"], params["bt4"],
                                       params["w5"], params["b5"])
    return scores.reshape(n, 1, 1, 1)


# --------------------------- params & reference ----------------------------- #
def init_params(key, channels_img, features_d):
    dims = [
        (channels_img, features_d),
        (features_d, features_d * 2),
        (features_d * 2, features_d * 4),
        (features_d * 4, features_d * 8),
        (features_d * 8, 1),
    ]
    params = {}
    for idx, (cin, cout) in enumerate(dims, start=1):
        key, kw, kb = jax.random.split(key, 3)
        params[f"w{idx}"] = jax.random.normal(kw, (cout, cin, 4, 4), jnp.float32) * 0.05
        params[f"b{idx}"] = jax.random.normal(kb, (cout,), jnp.float32) * 0.01
        if idx in (2, 3, 4):  # layers followed by BatchNorm (torch init: gamma=1, beta=0)
            params[f"g{idx}"] = jnp.ones((cout,), jnp.float32)
            params[f"bt{idx}"] = jnp.zeros((cout,), jnp.float32)
    return params


def reference_forward(x, params, *, bf16_matmul=False):
    """Pure-JAX reference mirroring the PyTorch module (training-mode BN).

    With bf16_matmul=True the conv operands are cast to bf16 (f32 accumulation),
    mirroring the Pallas kernels' MXU precision for a tight comparison.
    """
    cast = (lambda a: a.astype(jnp.bfloat16)) if bf16_matmul else (lambda a: a)

    def conv(h, w, b, stride, pad):
        y = jax.lax.conv_general_dilated(
            cast(h), cast(w), (stride, stride), ((pad, pad), (pad, pad)),
            dimension_numbers=("NCHW", "OIHW", "NCHW"),
            preferred_element_type=jnp.float32,
            precision=jax.lax.Precision.HIGHEST)
        return y + b.reshape(1, -1, 1, 1)

    def bn(h, g, bt):
        mean = jnp.mean(h, axis=(0, 2, 3), keepdims=True)
        var = jnp.mean(jnp.square(h - mean), axis=(0, 2, 3), keepdims=True)
        return (h - mean) * jax.lax.rsqrt(var + BN_EPS) * g.reshape(1, -1, 1, 1) \
            + bt.reshape(1, -1, 1, 1)

    def lrelu(h):
        return jnp.where(h >= 0, h, LRELU_SLOPE * h)

    h = lrelu(conv(x, params["w1"], params["b1"], 2, 1))
    h = lrelu(bn(conv(h, params["w2"], params["b2"], 2, 1), params["g2"], params["bt2"]))
    h = lrelu(bn(conv(h, params["w3"], params["b3"], 2, 1), params["g3"], params["bt3"]))
    h = lrelu(bn(conv(h, params["w4"], params["b4"], 2, 1), params["g4"], params["bt4"]))
    return jax.nn.sigmoid(conv(h, params["w5"], params["b5"], 2, 0))


# ---------------------------------- main ------------------------------------ #
if __name__ == "__main__":
    channels_img, features_d = 3, 8
    N, H, W = 2, 64, 64  # 64x64 input -> 32 -> 16 -> 8 -> 4 -> 1 (as the module implies)

    key = jax.random.PRNGKey(0)
    kx, kp = jax.random.split(key)
    x = jax.random.normal(kx, (N, channels_img, H, W), jnp.float32)
    params = init_params(kp, channels_img, features_d)

    out = jax.block_until_ready(jax.jit(discriminator_forward)(x, params))

    assert out.shape == (N, 1, 1, 1), out.shape
    assert bool(jnp.all(jnp.isfinite(out)))

    # Tight check vs a reference that mirrors the kernels' bf16-MXU precision,
    # loose check vs the full-f32 reference (bf16 matmul error budget).
    ref_bf16 = reference_forward(x, params, bf16_matmul=True)
    ref_f32 = reference_forward(x, params, bf16_matmul=False)
    assert bool(jnp.allclose(out, ref_bf16, atol=2e-3, rtol=2e-3)), (out, ref_bf16)
    assert bool(jnp.allclose(out, ref_f32, atol=5e-2, rtol=5e-2)), (out, ref_f32)

    # TODO(synk): BatchNorm running_mean/running_var updates (training-time buffer
    # side effects) are not tracked; only the forward output is reproduced.
    print("KERNEL_OK")
</pallas_src>

<mosaic_0001>
module attributes {stable_mosaic.version = 11 : i64} {
  func.func @_conv_bias_lrelu_kernel(%arg0: i32, %arg1: memref<8x48xbf16, #tpu.memory_space<vmem>>, %arg2: memref<48x2048xbf16, #tpu.memory_space<vmem>>, %arg3: memref<8x1xf32, #tpu.memory_space<vmem>>, %arg4: memref<8x2048xbf16, #tpu.memory_space<vmem>>) attributes {dimension_semantics = [#tpu.dimension_semantics<arbitrary>], iteration_bounds = array<i64: 1>, scalar_prefetch = 0 : i64, scratch_operands = 0 : i64, tpu.core_type = #tpu.core_type<tc>, window_params = [{pipeline_mode = #tpu.pipeline_mode<synchronous>, transform_indices = @transform_0, window_bounds = array<i64: 8, 48>}, {pipeline_mode = #tpu.pipeline_mode<synchronous>, transform_indices = @transform_1, window_bounds = array<i64: 48, 2048>}, {pipeline_mode = #tpu.pipeline_mode<synchronous>, transform_indices = @transform_2, window_bounds = array<i64: 8, 1>}, {pipeline_mode = #tpu.pipeline_mode<synchronous>, transform_indices = @transform_3, window_bounds = array<i64: 8, 2048>}]} {
    %c0 = arith.constant 0 : index
    %c0_0 = arith.constant 0 : index
    %0 = vector.load %arg1[%c0, %c0_0] : memref<8x48xbf16, #tpu.memory_space<vmem>>, vector<8x48xbf16>
    %c0_1 = arith.constant 0 : index
    %c0_2 = arith.constant 0 : index
    %1 = vector.load %arg2[%c0_1, %c0_2] : memref<48x2048xbf16, #tpu.memory_space<vmem>>, vector<48x2048xbf16>
    %cst = arith.constant dense<0.000000e+00> : vector<8x2048xf32>
    %2 = tpu.matmul %0, %1, %cst {dimension_numbers = #tpu.dot_dimension_numbers<[1], [0], [0], [1], [0, 0, 1, 1], [], []>} : vector<8x48xbf16>, vector<48x2048xbf16>, vector<8x2048xf32> -> vector<8x2048xf32>
    %c0_3 = arith.constant 0 : index
    %c0_4 = arith.constant 0 : index
    %3 = vector.load %arg3[%c0_3, %c0_4] : memref<8x1xf32, #tpu.memory_space<vmem>>, vector<8x1xf32>
    %4 = vector.broadcast %3 : vector<8x1xf32> to vector<8x2048xf32>
    %5 = arith.addf %2, %4 : vector<8x2048xf32>
    %cst_5 = arith.constant 0.000000e+00 : f32
    %6 = vector.broadcast %cst_5 : f32 to vector<8x2048xf32>
    %7 = arith.cmpf oge, %5, %6 : vector<8x2048xf32>
    %cst_6 = arith.constant 2.000000e-01 : f32
    %8 = vector.broadcast %cst_6 : f32 to vector<8x2048xf32>
    %9 = arith.mulf %8, %5 : vector<8x2048xf32>
    %10 = arith.select %7, %5, %9 : vector<8x2048xi1>, vector<8x2048xf32>
    %11 = arith.truncf %10 : vector<8x2048xf32> to vector<8x2048xbf16>
    %c0_7 = arith.constant 0 : index
    %c0_8 = arith.constant 0 : index
    %12 = vector.load %arg4[%c0_7, %c0_8] : memref<8x2048xbf16, #tpu.memory_space<vmem>>, vector<8x2048xbf16>
    tpu.vector_store %arg4[%c0_7, %c0_8], %11 {strides = array<i32>} : memref<8x2048xbf16, #tpu.memory_space<vmem>>, vector<8x2048xbf16>,
    return
  }
  func.func @transform_0(%arg0: i32) -> (i32, i32) {
    %c0_i32 = arith.constant 0 : i32
    %c0_i32_0 = arith.constant 0 : i32
    %c0_i32_1 = arith.constant 0 : i32
    return %c0_i32, %c0_i32_0 : i32, i32
  }
  func.func @transform_1(%arg0: i32) -> (i32, i32) {
    %c0_i32 = arith.constant 0 : i32
    %c0_i32_0 = arith.constant 0 : i32
    %c0_i32_1 = arith.constant 0 : i32
    return %c0_i32, %c0_i32_0 : i32, i32
  }
  func.func @transform_2(%arg0: i32) -> (i32, i32) {
    %c0_i32 = arith.constant 0 : i32
    %c0_i32_0 = arith.constant 0 : i32
    %c0_i32_1 = arith.constant 0 : i32
    return %c0_i32, %c0_i32_0 : i32, i32
  }
  func.func @transform_3(%arg0: i32) -> (i32, i32) {
    %c0_i32 = arith.constant 0 : i32
    %c0_i32_0 = arith.constant 0 : i32
    %c0_i32_1 = arith.constant 0 : i32
    return %c0_i32, %c0_i32_0 : i32, i32
  }
}

module attributes {stable_mosaic.version = 11 : i64} {
  func.func @_conv_bn_lrelu_kernel(%arg0: i32, %arg1: memref<16x128xbf16, #tpu.memory_space<vmem>>, %arg2: memref<128x512xbf16, #tpu.memory_space<vmem>>, %arg3: memref<16x1xf32, #tpu.memory_space<vmem>>, %arg4: memref<16x1xf32, #tpu.memory_space<vmem>>, %arg5: memref<16x512xbf16, #tpu.memory_space<vmem>>) attributes {dimension_semantics = [#tpu.dimension_semantics<arbitrary>], iteration_bounds = array<i64: 1>, scalar_prefetch = 0 : i64, scratch_operands = 0 : i64, tpu.core_type = #tpu.core_type<tc>, window_params = [{pipeline_mode = #tpu.pipeline_mode<synchronous>, transform_indices = @transform_0, window_bounds = array<i64: 16, 128>}, {pipeline_mode = #tpu.pipeline_mode<synchronous>, transform_indices = @transform_1, window_bounds = array<i64: 128, 512>}, {pipeline_mode = #tpu.pipeline_mode<synchronous>, transform_indices = @transform_2, window_bounds = array<i64: 16, 1>}, {pipeline_mode = #tpu.pipeline_mode<synchronous>, transform_indices = @transform_3, window_bounds = array<i64: 16, 1>}, {pipeline_mode = #tpu.pipeline_mode<synchronous>, transform_indices = @transform_4, window_bounds = array<i64: 16, 512>}]} {
    %c0 = arith.constant 0 : index
    %c0_0 = arith.constant 0 : index
    %0 = vector.load %arg1[%c0, %c0_0] : memref<16x128xbf16, #tpu.memory_space<vmem>>, vector<16x128xbf16>
    %c0_1 = arith.constant 0 : index
    %c0_2 = arith.constant 0 : index
    %1 = vector.load %arg2[%c0_1, %c0_2] : memref<128x512xbf16, #tpu.memory_space<vmem>>, vector<128x512xbf16>
    %cst = arith.constant dense<0.000000e+00> : vector<16x512xf32>
    %2 = tpu.matmul %0, %1, %cst {dimension_numbers = #tpu.dot_dimension_numbers<[1], [0], [0], [1], [0, 0, 1, 1], [], []>} : vector<16x128xbf16>, vector<128x512xbf16>, vector<16x512xf32> -> vector<16x512xf32>
    %cst_3 = arith.constant dense<0.000000e+00> : vector<16xf32>
    %3 = vector.multi_reduction <add>, %2, %cst_3 [1] : vector<16x512xf32> to vector<16xf32>
    %4 = vector.shape_cast %3 : vector<16xf32> to vector<16x1xf32>
    %cst_4 = arith.constant 5.120000e+02 : f32
    %5 = vector.broadcast %cst_4 : f32 to vector<16x1xf32>
    %6 = arith.divf %4, %5 : vector<16x1xf32>
    %7 = vector.broadcast %6 : vector<16x1xf32> to vector<16x512xf32>
    %8 = arith.subf %2, %7 : vector<16x512xf32>
    %9 = arith.mulf %8, %8 : vector<16x512xf32>
    %cst_5 = arith.constant dense<0.000000e+00> : vector<16xf32>
    %10 = vector.multi_reduction <add>, %9, %cst_5 [1] : vector<16x512xf32> to vector<16xf32>
    %11 = vector.shape_cast %10 : vector<16xf32> to vector<16x1xf32>
    %cst_6 = arith.constant 5.120000e+02 : f32
    %12 = vector.broadcast %cst_6 : f32 to vector<16x1xf32>
    %13 = arith.divf %11, %12 : vector<16x1xf32>
    %cst_7 = arith.constant 9.99999974E-6 : f32
    %14 = vector.broadcast %cst_7 : f32 to vector<16x1xf32>
    %15 = arith.addf %13, %14 : vector<16x1xf32>
    %16 = math.rsqrt %15 : vector<16x1xf32>
    %c0_8 = arith.constant 0 : index
    %c0_9 = arith.constant 0 : index
    %17 = vector.load %arg3[%c0_8, %c0_9] : memref<16x1xf32, #tpu.memory_space<vmem>>, vector<16x1xf32>
    %18 = arith.mulf %16, %17 : vector<16x1xf32>
    %19 = vector.broadcast %18 : vector<16x1xf32> to vector<16x512xf32>
    %20 = arith.mulf %8, %19 : vector<16x512xf32>
    %c0_10 = arith.constant 0 : index
    %c0_11 = arith.constant 0 : index
    %21 = vector.load %arg4[%c0_10, %c0_11] : memref<16x1xf32, #tpu.memory_space<vmem>>, vector<16x1xf32>
    %22 = vector.broadcast %21 : vector<16x1xf32> to vector<16x512xf32>
    %23 = arith.addf %20, %22 : vector<16x512xf32>
    %cst_12 = arith.constant 0.000000e+00 : f32
    %24 = vector.broadcast %cst_12 : f32 to vector<16x512xf32>
    %25 = arith.cmpf oge, %23, %24 : vector<16x512xf32>
    %cst_13 = arith.constant 2.000000e-01 : f32
    %26 = vector.broadcast %cst_13 : f32 to vector<16x512xf32>
    %27 = arith.mulf %26, %23 : vector<16x512xf32>
    %28 = arith.select %25, %23, %27 : vector<16x512xi1>, vector<16x512xf32>
    %29 = arith.truncf %28 : vector<16x512xf32> to vector<16x512xbf16>
    %c0_14 = arith.constant 0 : index
    %c0_15 = arith.constant 0 : index
    %30 = vector.load %arg5[%c0_14, %c0_15] : memref<16x512xbf16, #tpu.memory_space<vmem>>, vector<16x512xbf16>
    tpu.vector_store %arg5[%c0_14, %c0_15], %29 {strides = array<i32>} : memref<16x512xbf16, #tpu.memory_space<vmem>>, vector<16x512xbf16>,
    return
  }
  func.func @transform_0(%arg0: i32) -> (i32, i32) {
    %c0_i32 = arith.constant 0 : i32
    %c0_i32_0 = arith.constant 0 : i32
    %c0_i32_1 = arith.constant 0 : i32
    return %c0_i32, %c0_i32_0 : i32, i32
  }
  func.func @transform_1(%arg0: i32) -> (i32, i32) {
    %c0_i32 = arith.constant 0 : i32
    %c0_i32_0 = arith.constant 0 : i32
    %c0_i32_1 = arith.constant 0 : i32
    return %c0_i32, %c0_i32_0 : i32, i32
  }
  func.func @transform_2(%arg0: i32) -> (i32, i32) {
    %c0_i32 = arith.constant 0 : i32
    %c0_i32_0 = arith.constant 0 : i32
    %c0_i32_1 = arith.constant 0 : i32
    return %c0_i32, %c0_i32_0 : i32, i32
  }
  func.func @transform_3(%arg0: i32) -> (i32, i32) {
    %c0_i32 = arith.constant 0 : i32
    %c0_i32_0 = arith.constant 0 : i32
    %c0_i32_1 = arith.constant 0 : i32
    return %c0_i32, %c0_i32_0 : i32, i32
  }
  func.func @transform_4(%arg0: i32) -> (i32, i32) {
    %c0_i32 = arith.constant 0 : i32
    %c0_i32_0 = arith.constant 0 : i32
    %c0_i32_1 = arith.constant 0 : i32
    return %c0_i32, %c0_i32_0 : i32, i32
  }
}

module attributes {stable_mosaic.version = 11 : i64} {
  func.func @_conv_bn_lrelu_kernel(%arg0: i32, %arg1: memref<32x256xbf16, #tpu.memory_space<vmem>>, %arg2: memref<256x128xbf16, #tpu.memory_space<vmem>>, %arg3: memref<32x1xf32, #tpu.memory_space<vmem>>, %arg4: memref<32x1xf32, #tpu.memory_space<vmem>>, %arg5: memref<32x128xbf16, #tpu.memory_space<vmem>>) attributes {dimension_semantics = [#tpu.dimension_semantics<arbitrary>], iteration_bounds = array<i64: 1>, scalar_prefetch = 0 : i64, scratch_operands = 0 : i64, tpu.core_type = #tpu.core_type<tc>, window_params = [{pipeline_mode = #tpu.pipeline_mode<synchronous>, transform_indices = @transform_0, window_bounds = array<i64: 32, 256>}, {pipeline_mode = #tpu.pipeline_mode<synchronous>, transform_indices = @transform_1, window_bounds = array<i64: 256, 128>}, {pipeline_mode = #tpu.pipeline_mode<synchronous>, transform_indices = @transform_2, window_bounds = array<i64: 32, 1>}, {pipeline_mode = #tpu.pipeline_mode<synchronous>, transform_indices = @transform_3, window_bounds = array<i64: 32, 1>}, {pipeline_mode = #tpu.pipeline_mode<synchronous>, transform_indices = @transform_4, window_bounds = array<i64: 32, 128>}]} {
    %c0 = arith.constant 0 : index
    %c0_0 = arith.constant 0 : index
    %0 = vector.load %arg1[%c0, %c0_0] : memref<32x256xbf16, #tpu.memory_space<vmem>>, vector<32x256xbf16>
    %c0_1 = arith.constant 0 : index
    %c0_2 = arith.constant 0 : index
    %1 = vector.load %arg2[%c0_1, %c0_2] : memref<256x128xbf16, #tpu.memory_space<vmem>>, vector<256x128xbf16>
    %cst = arith.constant dense<0.000000e+00> : vector<32x128xf32>
    %2 = tpu.matmul %0, %1, %cst {dimension_numbers = #tpu.dot_dimension_numbers<[1], [0], [0], [1], [0, 0, 1, 1], [], []>} : vector<32x256xbf16>, vector<256x128xbf16>, vector<32x128xf32> -> vector<32x128xf32>
    %cst_3 = arith.constant dense<0.000000e+00> : vector<32xf32>
    %3 = vector.multi_reduction <add>, %2, %cst_3 [1] : vector<32x128xf32> to vector<32xf32>
    %4 = vector.shape_cast %3 : vector<32xf32> to vector<32x1xf32>
    %cst_4 = arith.constant 1.280000e+02 : f32
    %5 = vector.broadcast %cst_4 : f32 to vector<32x1xf32>
    %6 = arith.divf %4, %5 : vector<32x1xf32>
    %7 = vector.broadcast %6 : vector<32x1xf32> to vector<32x128xf32>
    %8 = arith.subf %2, %7 : vector<32x128xf32>
    %9 = arith.mulf %8, %8 : vector<32x128xf32>
    %cst_5 = arith.constant dense<0.000000e+00> : vector<32xf32>
    %10 = vector.multi_reduction <add>, %9, %cst_5 [1] : vector<32x128xf32> to vector<32xf32>
    %11 = vector.shape_cast %10 : vector<32xf32> to vector<32x1xf32>
    %cst_6 = arith.constant 1.280000e+02 : f32
    %12 = vector.broadcast %cst_6 : f32 to vector<32x1xf32>
    %13 = arith.divf %11, %12 : vector<32x1xf32>
    %cst_7 = arith.constant 9.99999974E-6 : f32
    %14 = vector.broadcast %cst_7 : f32 to vector<32x1xf32>
    %15 = arith.addf %13, %14 : vector<32x1xf32>
    %16 = math.rsqrt %15 : vector<32x1xf32>
    %c0_8 = arith.constant 0 : index
    %c0_9 = arith.constant 0 : index
    %17 = vector.load %arg3[%c0_8, %c0_9] : memref<32x1xf32, #tpu.memory_space<vmem>>, vector<32x1xf32>
    %18 = arith.mulf %16, %17 : vector<32x1xf32>
    %19 = vector.broadcast %18 : vector<32x1xf32> to vector<32x128xf32>
    %20 = arith.mulf %8, %19 : vector<32x128xf32>
    %c0_10 = arith.constant 0 : index
    %c0_11 = arith.constant 0 : index
    %21 = vector.load %arg4[%c0_10, %c0_11] : memref<32x1xf32, #tpu.memory_space<vmem>>, vector<32x1xf32>
    %22 = vector.broadcast %21 : vector<32x1xf32> to vector<32x128xf32>
    %23 = arith.addf %20, %22 : vector<32x128xf32>
    %cst_12 = arith.constant 0.000000e+00 : f32
    %24 = vector.broadcast %cst_12 : f32 to vector<32x128xf32>
    %25 = arith.cmpf oge, %23, %24 : vector<32x128xf32>
    %cst_13 = arith.constant 2.000000e-01 : f32
    %26 = vector.broadcast %cst_13 : f32 to vector<32x128xf32>
    %27 = arith.mulf %26, %23 : vector<32x128xf32>
    %28 = arith.select %25, %23, %27 : vector<32x128xi1>, vector<32x128xf32>
    %29 = arith.truncf %28 : vector<32x128xf32> to vector<32x128xbf16>
    %c0_14 = arith.constant 0 : index
    %c0_15 = arith.constant 0 : index
    %30 = vector.load %arg5[%c0_14, %c0_15] : memref<32x128xbf16, #tpu.memory_space<vmem>>, vector<32x128xbf16>
    tpu.vector_store %arg5[%c0_14, %c0_15], %29 {strides = array<i32>} : memref<32x128xbf16, #tpu.memory_space<vmem>>, vector<32x128xbf16>,
    return
  }
  func.func @transform_0(%arg0: i32) -> (i32, i32) {
    %c0_i32 = arith.constant 0 : i32
    %c0_i32_0 = arith.constant 0 : i32
    %c0_i32_1 = arith.constant 0 : i32
    return %c0_i32, %c0_i32_0 : i32, i32
  }
  func.func @transform_1(%arg0: i32) -> (i32, i32) {
    %c0_i32 = arith.constant 0 : i32
    %c0_i32_0 = arith.constant 0 : i32
    %c0_i32_1 = arith.constant 0 : i32
    return %c0_i32, %c0_i32_0 : i32, i32
  }
  func.func @transform_2(%arg0: i32) -> (i32, i32) {
    %c0_i32 = arith.constant 0 : i32
    %c0_i32_0 = arith.constant 0 : i32
    %c0_i32_1 = arith.constant 0 : i32
    return %c0_i32, %c0_i32_0 : i32, i32
  }
  func.func @transform_3(%arg0: i32) -> (i32, i32) {
    %c0_i32 = arith.constant 0 : i32
    %c0_i32_0 = arith.constant 0 : i32
    %c0_i32_1 = arith.constant 0 : i32
    return %c0_i32, %c0_i32_0 : i32, i32
  }
  func.func @transform_4(%arg0: i32) -> (i32, i32) {
    %c0_i32 = arith.constant 0 : i32
    %c0_i32_0 = arith.constant 0 : i32
    %c0_i32_1 = arith.constant 0 : i32
    return %c0_i32, %c0_i32_0 : i32, i32
  }
}

module attributes {stable_mosaic.version = 11 : i64} {
  func.func @_conv_bn_lrelu_head_kernel(%arg0: i32, %arg1: memref<64x512xbf16, #tpu.memory_space<vmem>>, %arg2: memref<512x32xbf16, #tpu.memory_space<vmem>>, %arg3: memref<64x1xf32, #tpu.memory_space<vmem>>, %arg4: memref<64x1xf32, #tpu.memory_space<vmem>>, %arg5: memref<64x32xbf16, #tpu.memory_space<vmem>>, %arg6: memref<32x2xf32, #tpu.memory_space<vmem>>, %arg7: memref<1x1xf32, #tpu.memory_space<vmem>>, %arg8: memref<1x2xf32, #tpu.memory_space<vmem>>) attributes {dimension_semantics = [#tpu.dimension_semantics<arbitrary>], iteration_bounds = array<i64: 1>, scalar_prefetch = 0 : i64, scratch_operands = 0 : i64, tpu.core_type = #tpu.core_type<tc>, window_params = [{pipeline_mode = #tpu.pipeline_mode<synchronous>, transform_indices = @transform_0, window_bounds = array<i64: 64, 512>}, {pipeline_mode = #tpu.pipeline_mode<synchronous>, transform_indices = @transform_1, window_bounds = array<i64: 512, 32>}, {pipeline_mode = #tpu.pipeline_mode<synchronous>, transform_indices = @transform_2, window_bounds = array<i64: 64, 1>}, {pipeline_mode = #tpu.pipeline_mode<synchronous>, transform_indices = @transform_3, window_bounds = array<i64: 64, 1>}, {pipeline_mode = #tpu.pipeline_mode<synchronous>, transform_indices = @transform_4, window_bounds = array<i64: 64, 32>}, {pipeline_mode = #tpu.pipeline_mode<synchronous>, transform_indices = @transform_5, window_bounds = array<i64: 32, 2>}, {pipeline_mode = #tpu.pipeline_mode<synchronous>, transform_indices = @transform_6, window_bounds = array<i64: 1, 1>}, {pipeline_mode = #tpu.pipeline_mode<synchronous>, transform_indices = @transform_7, window_bounds = array<i64: 1, 2>}]} {
    %c0 = arith.constant 0 : index
    %c0_0 = arith.constant 0 : index
    %0 = vector.load %arg1[%c0, %c0_0] : memref<64x512xbf16, #tpu.memory_space<vmem>>, vector<64x512xbf16>
    %c0_1 = arith.constant 0 : index
    %c0_2 = arith.constant 0 : index
    %1 = vector.load %arg2[%c0_1, %c0_2] : memref<512x32xbf16, #tpu.memory_space<vmem>>, vector<512x32xbf16>
    %cst = arith.constant dense<0.000000e+00> : vector<64x32xf32>
    %2 = tpu.matmul %0, %1, %cst {dimension_numbers = #tpu.dot_dimension_numbers<[1], [0], [0], [1], [0, 0, 1, 1], [], []>} : vector<64x512xbf16>, vector<512x32xbf16>, vector<64x32xf32> -> vector<64x32xf32>
    %cst_3 = arith.constant dense<0.000000e+00> : vector<64xf32>
    %3 = vector.multi_reduction <add>, %2, %cst_3 [1] : vector<64x32xf32> to vector<64xf32>
    %4 = vector.shape_cast %3 : vector<64xf32> to vector<64x1xf32>
    %cst_4 = arith.constant 3.200000e+01 : f32
    %5 = vector.broadcast %cst_4 : f32 to vector<64x1xf32>
    %6 = arith.divf %4, %5 : vector<64x1xf32>
    %7 = vector.broadcast %6 : vector<64x1xf32> to vector<64x32xf32>
    %8 = arith.subf %2, %7 : vector<64x32xf32>
    %9 = arith.mulf %8, %8 : vector<64x32xf32>
    %cst_5 = arith.constant dense<0.000000e+00> : vector<64xf32>
    %10 = vector.multi_reduction <add>, %9, %cst_5 [1] : vector<64x32xf32> to vector<64xf32>
    %11 = vector.shape_cast %10 : vector<64xf32> to vector<64x1xf32>
    %cst_6 = arith.constant 3.200000e+01 : f32
    %12 = vector.broadcast %cst_6 : f32 to vector<64x1xf32>
    %13 = arith.divf %11, %12 : vector<64x1xf32>
    %cst_7 = arith.constant 9.99999974E-6 : f32
    %14 = vector.broadcast %cst_7 : f32 to vector<64x1xf32>
    %15 = arith.addf %13, %14 : vector<64x1xf32>
    %16 = math.rsqrt %15 : vector<64x1xf32>
    %c0_8 = arith.constant 0 : index
    %c0_9 = arith.constant 0 : index
    %17 = vector.load %arg3[%c0_8, %c0_9] : memref<64x1xf32, #tpu.memory_space<vmem>>, vector<64x1xf32>
    %18 = arith.mulf %16, %17 : vector<64x1xf32>
    %19 = vector.broadcast %18 : vector<64x1xf32> to vector<64x32xf32>
    %20 = arith.mulf %8, %19 : vector<64x32xf32>
    %c0_10 = arith.constant 0 : index
    %c0_11 = arith.constant 0 : index
    %21 = vector.load %arg4[%c0_10, %c0_11] : memref<64x1xf32, #tpu.memory_space<vmem>>, vector<64x1xf32>
    %22 = vector.broadcast %21 : vector<64x1xf32> to vector<64x32xf32>
    %23 = arith.addf %20, %22 : vector<64x32xf32>
    %cst_12 = arith.constant 0.000000e+00 : f32
    %24 = vector.broadcast %cst_12 : f32 to vector<64x32xf32>
    %25 = arith.cmpf oge, %23, %24 : vector<64x32xf32>
    %cst_13 = arith.constant 2.000000e-01 : f32
    %26 = vector.broadcast %cst_13 : f32 to vector<64x32xf32>
    %27 = arith.mulf %26, %23 : vector<64x32xf32>
    %28 = arith.select %25, %23, %27 : vector<64x32xi1>, vector<64x32xf32>
    %29 = arith.truncf %28 : vector<64x32xf32> to vector<64x32xbf16>
    %30 = arith.extf %29 : vector<64x32xbf16> to vector<64x32xf32>
    %c0_14 = arith.constant 0 : index
    %c0_15 = arith.constant 0 : index
    %31 = vector.load %arg5[%c0_14, %c0_15] : memref<64x32xbf16, #tpu.memory_space<vmem>>, vector<64x32xbf16>
    %32 = arith.extf %31 : vector<64x32xbf16> to vector<64x32xf32>
    %33 = arith.mulf %30, %32 : vector<64x32xf32>
    %c0_16 = arith.constant 0 : index
    %c0_17 = arith.constant 0 : index
    %34 = vector.load %arg6[%c0_16, %c0_17] : memref<32x2xf32, #tpu.memory_space<vmem>>, vector<32x2xf32>
    %cst_18 = arith.constant dense<0.000000e+00> : vector<64x2xf32>
    %35 = tpu.matmul %33, %34, %cst_18 {dimension_numbers = #tpu.dot_dimension_numbers<[1], [0], [0], [1], [0, 0, 1, 1], [], []>} : vector<64x32xf32>, vector<32x2xf32>, vector<64x2xf32> -> vector<64x2xf32>
    %cst_19 = arith.constant dense<0.000000e+00> : vector<2xf32>
    %36 = vector.multi_reduction <add>, %35, %cst_19 [0] : vector<64x2xf32> to vector<2xf32>
    %37 = vector.shape_cast %36 : vector<2xf32> to vector<1x2xf32>
    %c0_20 = arith.constant 0 : index
    %c0_21 = arith.constant 0 : index
    %38 = vector.load %arg7[%c0_20, %c0_21] : memref<1x1xf32, #tpu.memory_space<vmem>>, vector<1x1xf32>
    %39 = vector.broadcast %38 : vector<1x1xf32> to vector<1x2xf32>
    %40 = arith.addf %37, %39 : vector<1x2xf32>
    %41 = arith.negf %40 : vector<1x2xf32>
    %42 = math.exp %41 : vector<1x2xf32>
    %cst_22 = arith.constant 1.000000e+00 : f32
    %43 = vector.broadcast %cst_22 : f32 to vector<1x2xf32>
    %44 = arith.addf %43, %42 : vector<1x2xf32>
    %45 = arith.divf %43, %44 : vector<1x2xf32>
    %c0_23 = arith.constant 0 : index
    %c0_24 = arith.constant 0 : index
    %46 = vector.load %arg8[%c0_23, %c0_24] : memref<1x2xf32, #tpu.memory_space<vmem>>, vector<1x2xf32>
    tpu.vector_store %arg8[%c0_23, %c0_24], %45 {strides = array<i32>} : memref<1x2xf32, #tpu.memory_space<vmem>>, vector<1x2xf32>,
    return
  }
  func.func @transform_0(%arg0: i32) -> (i32, i32) {
    %c0_i32 = arith.constant 0 : i32
    %c0_i32_0 = arith.constant 0 : i32
    %c0_i32_1 = arith.constant 0 : i32
    return %c0_i32, %c0_i32_0 : i32, i32
  }
  func.func @transform_1(%arg0: i32) -> (i32, i32) {
    %c0_i32 = arith.constant 0 : i32
    %c0_i32_0 = arith.constant 0 : i32
    %c0_i32_1 = arith.constant 0 : i32
    return %c0_i32, %c0_i32_0 : i32, i32
  }
  func.func @transform_2(%arg0: i32) -> (i32, i32) {
    %c0_i32 = arith.constant 0 : i32
    %c0_i32_0 = arith.constant 0 : i32
    %c0_i32_1 = arith.constant 0 : i32
    return %c0_i32, %c0_i32_0 : i32, i32
  }
  func.func @transform_3(%arg0: i32) -> (i32, i32) {
    %c0_i32 = arith.constant 0 : i32
    %c0_i32_0 = arith.constant 0 : i32
    %c0_i32_1 = arith.constant 0 : i32
    return %c0_i32, %c0_i32_0 : i32, i32
  }
  func.func @transform_4(%arg0: i32) -> (i32, i32) {
    %c0_i32 = arith.constant 0 : i32
    %c0_i32_0 = arith.constant 0 : i32
    %c0_i32_1 = arith.constant 0 : i32
    return %c0_i32, %c0_i32_0 : i32, i32
  }
  func.func @transform_5(%arg0: i32) -> (i32, i32) {
    %c0_i32 = arith.constant 0 : i32
    %c0_i32_0 = arith.constant 0 : i32
    %c0_i32_1 = arith.constant 0 : i32
    return %c0_i32, %c0_i32_0 : i32, i32
  }
  func.func @transform_6(%arg0: i32) -> (i32, i32) {
    %c0_i32 = arith.constant 0 : i32
    %c0_i32_0 = arith.constant 0 : i32
    %c0_i32_1 = arith.constant 0 : i32
    return %c0_i32, %c0_i32_0 : i32, i32
  }
  func.func @transform_7(%arg0: i32) -> (i32, i32) {
    %c0_i32 = arith.constant 0 : i32
    %c0_i32_0 = arith.constant 0 : i32
    %c0_i32_1 = arith.constant 0 : i32
    return %c0_i32, %c0_i32_0 : i32, i32
  }
}

</mosaic_0001>

<bundles_post_ra>
// kernel: discriminator_forward.4
= control target key start
LH: loop header
LB: loop body
LE: loop exit
PB: predicated region body
PF: predicated region fallthrough
CT: control target
= control target key end

     0   :  { %v840_v3 = vmov 0   ;;  %vm310_vm0 = vcmask 392192   ;;  %s1080_s1 = inlined_call_operand.vmem [shape: bf16[48,2048], index: 1, kind: input, shape index: {}]   ;;  %s1081_s0 = inlined_call_operand.vmem [shape: bf16[8,48], index: 0, kind: input, shape index: {}]   ;;  %s1082_s2 = inlined_call_operand.vmem [shape: f32[8,1], index: 2, kind: input, shape index: {}]   ;;  %s1083_s3 = inlined_call_operand.vmem [shape: bf16[8,2048], index: 3, kind: output, shape index: {}]  }
   0x1   :  { %v48_v0 = vld [vmem:[%s1080_s1 + $0x100] sm:$0xff]  ;;  %v49_v2 = vld [vmem:[%s1080_s1 + $0x108] sm:$0xff]  ;;  %346 = vmatprep.mubr.bf16.mxu0 %v840_v3  ;;  %387 = vmatprep.mubr.bf16.mxu1 %v840_v3  ;;  %v50_v23 = vld [vmem:[%s1080_s1 + $0x110] sm:$0xff] }
   0x2   :  { %v56_v1 = vld [vmem:[%s1080_s1 + $0x140] sm:$0xff]  ;;  %v57_v5 = vld [vmem:[%s1080_s1 + $0x148] sm:$0xff]  ;;  %839 = vset.pattern.permute.xlu0 %v840_v3  ;;  %v58_v24 = vld [vmem:[%s1080_s1 + $0x150] sm:$0xff] }
   0x3   :  { %v799_v4 = vcombine.high %v48_v0, %v56_v1  ;;  %v798_v6 = vcombine.low %v48_v0, %v56_v1  ;;  %v32_v7 = vld [vmem:[%s1080_s1 + $0x80] sm:$0xff]  ;;  %v801_v9 = vcombine.high %v49_v2, %v57_v5  ;;  %v800_v10 = vcombine.low %v49_v2, %v57_v5  ;;  %v33_v12 = vld [vmem:[%s1080_s1 + $0x88] sm:$0xff]  ;;  %v51_v25 = vld [vmem:[%s1080_s1 + $0x118] sm:$0xff] }
   0x4   :  { %v40_v8 = vld [vmem:[%s1080_s1 + $0xc0] sm:$0xff]  ;;  %v41_v13 = vld [vmem:[%s1080_s1 + $0xc8] sm:$0xff]  ;;  %v59_v26 = vld [vmem:[%s1080_s1 + $0x158] sm:$0xff]  ;;  %v803_v29 = vcombine.high %v50_v23, %v58_v24  ;;  %v802_v36 = vcombine.low %v50_v23, %v58_v24 }
   0x5   :  { %v783_v11 = vcombine.high %v32_v7, %v40_v8  ;;  %v16_v14 = vld [vmem:[%s1080_s1] sm:$0xff]  ;;  %324 = vmatprep.subr.bf16.mxu0 %v799_v4  ;;  %v785_v15 = vcombine.high %v33_v12, %v41_v13  ;;  %v17_v17 = vld [vmem:[%s1080_s1 + $0x8] sm:$0xff]  ;;  %365 = vmatprep.subr.bf16.mxu1 %v801_v9  ;;  %v782_v19 = vcombine.low %v32_v7, %v40_v8  ;;  %v34_v31 = vld [vmem:[%s1080_s1 + $0x90] sm:$0xff] }
   0x6   :  { %v24_v16 = vld [vmem:[%s1080_s1 + $0x40] sm:$0xff]  ;;  %v25_v18 = vld [vmem:[%s1080_s1 + $0x48] sm:$0xff]  ;;  %325 = vmatpush1.bf16.msra.mxu0 %v798_v6  ;;  %366 = vmatpush1.bf16.msra.mxu1 %v800_v10  ;;  %v784_v20 = vcombine.low %v33_v12, %v41_v13  ;;  %v805_v30 = vcombine.high %v51_v25, %v59_v26  ;;  %v42_v32 = vld [vmem:[%s1080_s1 + $0xd0] sm:$0xff]  ;;  %v804_v37 = vcombine.low %v51_v25, %v59_v26 }
   0x7   :  { %326 = vmatprep.subr.bf16.mxu0 %v783_v11  ;;  %v767_v21 = vcombine.high %v16_v14, %v24_v16  ;;  %367 = vmatprep.subr.bf16.mxu1 %v785_v15  ;;  %v769_v22 = vcombine.high %v17_v17, %v25_v18  ;;  %v766_v27 = vcombine.low %v16_v14, %v24_v16  ;;  %v35_v33 = vld [vmem:[%s1080_s1 + $0x98] sm:$0xff]  ;;  %v927_v35 = vld [vmem:[%s1081_s0] sm:$0xf]  ;;  %v18_v40 = vld [vmem:[%s1080_s1 + $0x10] sm:$0xff] }
   0x8   :  { %v768_v28 = vcombine.low %v17_v17, %v25_v18  ;;  %v43_v34 = vld [vmem:[%s1080_s1 + $0xd8] sm:$0xff]  ;;  %v787_v38 = vcombine.high %v34_v31, %v42_v32  ;;  %v26_v41 = vld [vmem:[%s1080_s1 + $0x50] sm:$0xff]  ;;  %v786_v44 = vcombine.low %v34_v31, %v42_v32  ;;  %v64_v45 = vld [vmem:[%s1082_s2] sm:$0xff] }
   0x9   :  { %v789_v39 = vcombine.high %v35_v33, %v43_v34  ;;  %v19_v42 = vld [vmem:[%s1080_s1 + $0x18] sm:$0xff]  ;;  %v788_v46 = vcombine.low %v35_v33, %v43_v34  ;;  %v771_v47 = vcombine.high %v18_v40, %v26_v41  ;;  %v52_v49 = vld [vmem:[%s1080_s1 + $0x120] sm:$0xff]  ;;  %v53_v51 = vld [vmem:[%s1080_s1 + $0x128] sm:$0xff]  ;;  %67 = vperm.xlu0 %839, %v64_v45   ;;  %v770_v53 = vcombine.low %v18_v40, %v26_v41 }
   0xa   :  { %327 = vmatpush1.bf16.msra.mxu0 %v782_v19  ;;  %368 = vmatpush1.bf16.msra.mxu1 %v784_v20  ;;  %v27_v43 = vld [vmem:[%s1080_s1 + $0x58] sm:$0xff]  ;;  %v60_v50 = vld [vmem:[%s1080_s1 + $0x160] sm:$0xff]  ;;  %v61_v52 = vld [vmem:[%s1080_s1 + $0x168] sm:$0xff] }
   0xb   :  { %328 = vmatprep.subr.bf16.mxu0 %v767_v21  ;;  %369 = vmatprep.subr.bf16.mxu1 %v769_v22  ;;  %v773_v48 = vcombine.high %v19_v42, %v27_v43  ;;  %v772_v54 = vcombine.low %v19_v42, %v27_v43  ;;  %v807_v55 = vcombine.high %v52_v49, %v60_v50  ;;  %v36_v57 = vld [vmem:[%s1080_s1 + $0xa0] sm:$0xff]  ;;  %v37_v59 = vld [vmem:[%s1080_s1 + $0xa8] sm:$0xff]  ;;  %v54_v10 = vld [vmem:[%s1080_s1 + $0x130] sm:$0xff] }
   0xc   :  { %v809_v56 = vcombine.high %v53_v51, %v61_v52  ;;  %v44_v58 = vld [vmem:[%s1080_s1 + $0xe0] sm:$0xff]  ;;  %v45_v60 = vld [vmem:[%s1080_s1 + $0xe8] sm:$0xff]  ;;  %v806_v61 = vcombine.low %v52_v49, %v60_v50  ;;  %v808_v62 = vcombine.low %v53_v51, %v61_v52  ;;  %v62_v11 = vld [vmem:[%s1080_s1 + $0x170] sm:$0xff] }
   0xd   :  { %v791_v63 = vcombine.high %v36_v57, %v44_v58  ;;  %v793_v0 = vcombine.high %v37_v59, %v45_v60  ;;  %v20_v1 = vld [vmem:[%s1080_s1 + $0x20] sm:$0xff]  ;;  %v21_v4 = vld [vmem:[%s1080_s1 + $0x28] sm:$0xff]  ;;  %v790_v6 = vcombine.low %v36_v57, %v44_v58  ;;  %v792_v7 = vcombine.low %v37_v59, %v45_v60  ;;  %v55_v12 = vld [vmem:[%s1080_s1 + $0x138] sm:$0xff] }
   0xe   :  { %329 = vmatpush1.bf16.msra.mxu0 %v766_v27  ;;  %370 = vmatpush1.bf16.msra.mxu1 %v768_v28  ;;  %v28_v2 = vld [vmem:[%s1080_s1 + $0x60] sm:$0xff]  ;;  %v29_v5 = vld [vmem:[%s1080_s1 + $0x68] sm:$0xff]  ;;  %v63_v13 = vld [vmem:[%s1080_s1 + $0x178] sm:$0xff]  ;;  %v811_v16 = vcombine.high %v54_v10, %v62_v11  ;;  %v810_v22 = vcombine.low %v54_v10, %v62_v11 }
   0xf   :  { %406 = vmatprep.subr.bf16.mxu0 %v803_v29  ;;  %447 = vmatprep.subr.bf16.mxu1 %v805_v30  ;;  %v775_v8 = vcombine.high %v20_v1, %v28_v2  ;;  %v777_v9 = vcombine.high %v21_v4, %v29_v5  ;;  %v774_v14 = vcombine.low %v20_v1, %v28_v2  ;;  %v38_v18 = vld [vmem:[%s1080_s1 + $0xb0] sm:$0xff]  ;;  %v39_v20 = vld [vmem:[%s1080_s1 + $0xb8] sm:$0xff] }
  0x10   :  { %v776_v15 = vcombine.low %v21_v4, %v29_v5  ;;  %v813_v17 = vcombine.high %v55_v12, %v63_v13  ;;  %v46_v19 = vld [vmem:[%s1080_s1 + $0xf0] sm:$0xff]  ;;  %v47_v21 = vld [vmem:[%s1080_s1 + $0xf8] sm:$0xff]  ;;  %v812_v23 = vcombine.low %v55_v12, %v63_v13 }
  0x11   :  { %814 = vmatmul.mubr.msk.bf16.vlgmr.msra.gmra.mxu0 %vm310_vm0, %v927_v35  ;;  %815 = vmatmul.mubr.msk.bf16.vlgmr.msra.gmra.mxu1 %vm310_vm0, %v927_v35  ;;  %v795_v24 = vcombine.high %v38_v18, %v46_v19  ;;  %v797_v25 = vcombine.high %v39_v20, %v47_v21  ;;  %v22_v26 = vld [vmem:[%s1080_s1 + $0x30] sm:$0xff]  ;;  %v23_v28 = vld [vmem:[%s1080_s1 + $0x38] sm:$0xff]  ;;  %v794_v30 = vcombine.low %v38_v18, %v46_v19 }
  0x12   :  { %407 = vmatpush1.bf16.msra.mxu0 %v802_v36  ;;  %448 = vmatpush1.bf16.msra.mxu1 %v804_v37  ;;  %v30_v27 = vld [vmem:[%s1080_s1 + $0x70] sm:$0xff]  ;;  %v31_v29 = vld [vmem:[%s1080_s1 + $0x78] sm:$0xff]  ;;  %v796_v31 = vcombine.low %v39_v20, %v47_v21 }
  0x13   :  { %408 = vmatprep.subr.bf16.mxu0 %v787_v38  ;;  %449 = vmatprep.subr.bf16.mxu1 %v789_v39  ;;  %v779_v32 = vcombine.high %v22_v26, %v30_v27  ;;  %v781_v33 = vcombine.high %v23_v28, %v31_v29  ;;  %v778_v34 = vcombine.low %v22_v26, %v30_v27 }
  0x14   :  { %428 = vmatprep.mubr.bf16.mxu0 %v840_v3  ;;  %469 = vmatprep.mubr.bf16.mxu1 %v840_v3  ;;  %v780_v36 = vcombine.low %v23_v28, %v31_v29 }
  0x16   :  { %409 = vmatpush1.bf16.msra.mxu0 %v786_v44  ;;  %450 = vmatpush1.bf16.msra.mxu1 %v788_v46 }
  0x17   :  { %410 = vmatprep.subr.bf16.mxu0 %v771_v47  ;;  %451 = vmatprep.subr.bf16.mxu1 %v773_v48 }
  0x1a   :  { %411 = vmatpush1.bf16.msra.mxu0 %v770_v53  ;;  %452 = vmatpush1.bf16.msra.mxu1 %v772_v54 }
  0x1b   :  { %488 = vmatprep.subr.bf16.mxu0 %v807_v55  ;;  %529 = vmatprep.subr.bf16.mxu1 %v809_v56 }
  0x1d   :  { %816 = vmatmul.mubr.msk.bf16.vlgmr.msra.gmra.mxu0 %vm310_vm0, %v927_v35  ;;  %817 = vmatmul.mubr.msk.bf16.vlgmr.msra.gmra.mxu1 %vm310_vm0, %v927_v35 }
  0x1e   :  { %489 = vmatpush1.bf16.msra.mxu0 %v806_v61  ;;  %530 = vmatpush1.bf16.msra.mxu1 %v808_v62 }
  0x1f   :  { %490 = vmatprep.subr.bf16.mxu0 %v791_v63  ;;  %531 = vmatprep.subr.bf16.mxu1 %v793_v0 }
  0x20   :  { %510 = vmatprep.mubr.bf16.mxu0 %v840_v3  ;;  %551 = vmatprep.mubr.bf16.mxu1 %v840_v3 }
  0x22   :  { %491 = vmatpush1.bf16.msra.mxu0 %v790_v6  ;;  %532 = vmatpush1.bf16.msra.mxu1 %v792_v7 }
  0x23   :  { %492 = vmatprep.subr.bf16.mxu0 %v775_v8  ;;  %533 = vmatprep.subr.bf16.mxu1 %v777_v9 }
  0x26   :  { %493 = vmatpush1.bf16.msra.mxu0 %v774_v14  ;;  %534 = vmatpush1.bf16.msra.mxu1 %v776_v15 }
  0x27   :  { %570 = vmatprep.subr.bf16.mxu0 %v811_v16  ;;  %611 = vmatprep.subr.bf16.mxu1 %v813_v17 }
  0x29   :  { %818 = vmatmul.mubr.msk.bf16.vlgmr.msra.gmra.mxu0 %vm310_vm0, %v927_v35  ;;  %819 = vmatmul.mubr.msk.bf16.vlgmr.msra.gmra.mxu1 %vm310_vm0, %v927_v35 }
  0x2a   :  { %571 = vmatpush1.bf16.msra.mxu0 %v810_v22  ;;  %612 = vmatpush1.bf16.msra.mxu1 %v812_v23 }
  0x2b   :  { %572 = vmatprep.subr.bf16.mxu0 %v795_v24  ;;  %613 = vmatprep.subr.bf16.mxu1 %v797_v25 }
  0x2c   :  { %592 = vmatprep.mubr.bf16.mxu0 %v840_v3  ;;  %633 = vmatprep.mubr.bf16.mxu1 %v840_v3 }
  0x2e   :  { %573 = vmatpush1.bf16.msra.mxu0 %v794_v30  ;;  %614 = vmatpush1.bf16.msra.mxu1 %v796_v31 }
  0x2f   :  { %574 = vmatprep.subr.bf16.mxu0 %v779_v32  ;;  %615 = vmatprep.subr.bf16.mxu1 %v781_v33 }
  0x32   :  { %575 = vmatpush1.bf16.msra.mxu0 %v778_v34  ;;  %616 = vmatpush1.bf16.msra.mxu1 %v780_v36 }
  0x35   :  { %820 = vmatmul.mubr.msk.bf16.vlgmr.msra.gmra.mxu0 %vm310_vm0, %v927_v35  ;;  %821 = vmatmul.mubr.msk.bf16.vlgmr.msra.gmra.mxu1 %vm310_vm0, %v927_v35 }
  0x84   :  { %v1038_v37 = vpop.permute.xlu0 %67 }
  0xd1   :  { %v348_v38 = vpop.f32.mrf.mxu0  ;;  %v389_v3 = vpop.f32.mrf.mxu1 }
  0xd2   :  { %v349_v39 = vadd.f32 %v348_v38, %v1038_v37  ;;  %v390_v40 = vadd.f32 %v389_v3, %v1038_v37 }
  0xd3   :  { %v350_v41 = vpop.f32.mrf.mxu0  ;;  %v391_v44 = vpop.f32.mrf.mxu1 }
  0xd4   :  { %v658_v42 = vmul.f32 0.2, %v349_v39  ;;  %v351_v43 = vadd.f32 %v350_v41, %v1038_v37  ;;  %vm642_vm1 = vcmp.ge.f32.partialorder %v349_v39, 0.0  ;;  %v660_v45 = vmul.f32 0.2, %v390_v40 }
  0xd5   :  { %v392_v46 = vadd.f32 %v391_v44, %v1038_v37  ;;  %v352_v47 = vpop.f32.mrf.mxu0  ;;  %vm644_vm2 = vcmp.ge.f32.partialorder %v390_v40, 0.0  ;;  %v393_v48 = vpop.f32.mrf.mxu1 }
  0xd6   :  { %vm643_vm3 = vcmp.ge.f32.partialorder %v351_v43, 0.0  ;;  %v659_v35 = vmul.f32 0.2, %v351_v43  ;;  %v674_v51 = vsel %vm642_vm1, %v349_v39, %v658_v42  ;;  %v676_v54 = vsel %vm644_vm2, %v390_v40, %v660_v45 }
  0xd7   :  { %vm645_vm4 = vcmp.ge.f32.partialorder %v392_v46, 0.0  ;;  %v661_v49 = vmul.f32 0.2, %v392_v46  ;;  %v353_v50 = vpop.f32.mrf.mxu0  ;;  %v394_v53 = vpop.f32.mrf.mxu1 }
  0xd8   :  { %v675_v52 = vsel %vm643_vm3, %v351_v43, %v659_v35 }
  0xd9   :  { %v830_v55 = vpack.c.bf16 %v675_v52, %v674_v51  ;;  %v677_v56 = vsel %vm645_vm4, %v392_v46, %v661_v49 }
  0xda   :  { %v831_v57 = vpack.c.bf16 %v677_v56, %v676_v54 }
  0xdb   :  { %754 = vst [vmem:[%s1083_s3] sm:$0xff] %v830_v55 }
  0xdc   :  { %755 = vst [vmem:[%s1083_s3 + $0x8] sm:$0xff] %v831_v57 }
  0xdd   :  { %v430_v58 = vpop.f32.mrf.mxu0  ;;  %v471_v60 = vpop.f32.mrf.mxu1 }
  0xde   :  { %v431_v59 = vadd.f32 %v430_v58, %v1038_v37  ;;  %v472_v61 = vadd.f32 %v471_v60, %v1038_v37 }
  0xdf   :  { %v432_v62 = vpop.f32.mrf.mxu0  ;;  %v473_v1 = vpop.f32.mrf.mxu1 }
  0xe0   :  { %v662_v63 = vmul.f32 0.2, %v431_v59  ;;  %v433_v0 = vadd.f32 %v432_v62, %v1038_v37  ;;  %vm646_vm5 = vcmp.ge.f32.partialorder %v431_v59, 0.0  ;;  %v664_v2 = vmul.f32 0.2, %v472_v61 }
  0xe1   :  { %v474_v4 = vadd.f32 %v473_v1, %v1038_v37  ;;  %v434_v5 = vpop.f32.mrf.mxu0  ;;  %vm648_vm6 = vcmp.ge.f32.partialorder %v472_v61, 0.0  ;;  %v475_v7 = vpop.f32.mrf.mxu1 }
  0xe2   :  { %vm647_vm7 = vcmp.ge.f32.partialorder %v433_v0, 0.0  ;;  %v663_v6 = vmul.f32 0.2, %v433_v0  ;;  %v678_v10 = vsel %vm646_vm5, %v431_v59, %v662_v63  ;;  %v680_v13 = vsel %vm648_vm6, %v472_v61, %v664_v2 }
  0xe3   :  { %vm649_vm8 = vcmp.ge.f32.partialorder %v474_v4, 0.0  ;;  %v665_v8 = vmul.f32 0.2, %v474_v4  ;;  %v435_v9 = vpop.f32.mrf.mxu0  ;;  %v476_v12 = vpop.f32.mrf.mxu1 }
  0xe4   :  { %v679_v11 = vsel %vm647_vm7, %v433_v0, %v663_v6 }
  0xe5   :  { %v832_v14 = vpack.c.bf16 %v679_v11, %v678_v10  ;;  %v681_v15 = vsel %vm649_vm8, %v474_v4, %v665_v8 }
  0xe6   :  { %v833_v16 = vpack.c.bf16 %v681_v15, %v680_v13 }
  0xe7   :  { %756 = vst [vmem:[%s1083_s3 + $0x10] sm:$0xff] %v832_v14 }
  0xe8   :  { %757 = vst [vmem:[%s1083_s3 + $0x18] sm:$0xff] %v833_v16 }
  0xe9   :  { %v512_v17 = vpop.f32.mrf.mxu0  ;;  %v553_v19 = vpop.f32.mrf.mxu1 }
  0xea   :  { %v513_v18 = vadd.f32 %v512_v17, %v1038_v37  ;;  %v554_v20 = vadd.f32 %v553_v19, %v1038_v37 }
  0xeb   :  { %v514_v21 = vpop.f32.mrf.mxu0  ;;  %v555_v24 = vpop.f32.mrf.mxu1 }
  0xec   :  { %v666_v22 = vmul.f32 0.2, %v513_v18  ;;  %v515_v23 = vadd.f32 %v514_v21, %v1038_v37  ;;  %vm650_vm9 = vcmp.ge.f32.partialorder %v513_v18, 0.0  ;;  %v668_v25 = vmul.f32 0.2, %v554_v20 }
  0xed   :  { %v556_v26 = vadd.f32 %v555_v24, %v1038_v37  ;;  %v516_v27 = vpop.f32.mrf.mxu0  ;;  %vm652_vm10 = vcmp.ge.f32.partialorder %v554_v20, 0.0  ;;  %v557_v29 = vpop.f32.mrf.mxu1 }
  0xee   :  { %vm651_vm11 = vcmp.ge.f32.partialorder %v515_v23, 0.0  ;;  %v667_v28 = vmul.f32 0.2, %v515_v23  ;;  %v682_v32 = vsel %vm650_vm9, %v513_v18, %v666_v22  ;;  %v684_v36 = vsel %vm652_vm10, %v554_v20, %v668_v25 }
  0xef   :  { %vm653_vm12 = vcmp.ge.f32.partialorder %v556_v26, 0.0  ;;  %v669_v30 = vmul.f32 0.2, %v556_v26  ;;  %v517_v31 = vpop.f32.mrf.mxu0  ;;  %v558_v34 = vpop.f32.mrf.mxu1 }
  0xf0   :  { %v683_v33 = vsel %vm651_vm11, %v515_v23, %v667_v28 }
  0xf1   :  { %v834_v38 = vpack.c.bf16 %v683_v33, %v682_v32  ;;  %v685_v39 = vsel %vm653_vm12, %v556_v26, %v669_v30 }
  0xf2   :  { %v835_v3 = vpack.c.bf16 %v685_v39, %v684_v36 }
  0xf3   :  { %758 = vst [vmem:[%s1083_s3 + $0x20] sm:$0xff] %v834_v38 }
  0xf4   :  { %759 = vst [vmem:[%s1083_s3 + $0x28] sm:$0xff] %v835_v3 }
  0xf5   :  { %v594_v40 = vpop.f32.mrf.mxu0  ;;  %v635_v42 = vpop.f32.mrf.mxu1 }
  0xf6   :  { %v595_v41 = vadd.f32 %v594_v40, %v1038_v37  ;;  %v636_v43 = vadd.f32 %v635_v42, %v1038_v37 }
  0xf7   :  { %v596_v44 = vpop.f32.mrf.mxu0  ;;  %v637_v47 = vpop.f32.mrf.mxu1 }
  0xf8   :  { %v670_v45 = vmul.f32 0.2, %v595_v41  ;;  %v597_v46 = vadd.f32 %v596_v44, %v1038_v37  ;;  %vm654_vm13 = vcmp.ge.f32.partialorder %v595_v41, 0.0  ;;  %v672_v35 = vmul.f32 0.2, %v636_v43 }
  0xf9   :  { %v638_v48 = vadd.f32 %v637_v47, %v1038_v37  ;;  %v598_v49 = vpop.f32.mrf.mxu0  ;;  %vm656_vm14 = vcmp.ge.f32.partialorder %v636_v43, 0.0  ;;  %v639_v51 = vpop.f32.mrf.mxu1 }
  0xfa   :  { %vm655_vm15 = vcmp.ge.f32.partialorder %v597_v46, 0.0  ;;  %v671_v50 = vmul.f32 0.2, %v597_v46  ;;  %v686_v54 = vsel %vm654_vm13, %v595_v41, %v670_v45  ;;  %v688_v57 = vsel %vm656_vm14, %v636_v43, %v672_v35 }
  0xfb   :  { %vm657_vm0 = vcmp.ge.f32.partialorder %v638_v48, 0.0  ;;  %v673_v52 = vmul.f32 0.2, %v638_v48  ;;  %v599_v53 = vpop.f32.mrf.mxu0  ;;  %v640_v56 = vpop.f32.mrf.mxu1 }
  0xfc   :  { %v687_v55 = vsel %vm655_vm15, %v597_v46, %v671_v50 }
  0xfd   :  { %v836_v58 = vpack.c.bf16 %v687_v55, %v686_v54  ;;  %v689_v59 = vsel %vm657_vm0, %v638_v48, %v673_v52 }
  0xfe   :  { %v837_v60 = vpack.c.bf16 %v689_v59, %v688_v57 }
  0xff   :  { %760 = vst [vmem:[%s1083_s3 + $0x30] sm:$0xff] %v836_v58 }
 0x100   :  { %761 = vst [vmem:[%s1083_s3 + $0x38] sm:$0xff] %v837_v60 }

// kernel: discriminator_forward.5
= control target key start
LH: loop header
LB: loop body
LE: loop exit
PB: predicated region body
PF: predicated region fallthrough
CT: control target
= control target key end

     0   :  { %v544_v1 = vmov 0   ;;  %s693_s1 = inlined_call_operand.vmem [shape: bf16[128,512], index: 1, kind: input, shape index: {}]   ;;  %s694_s0 = inlined_call_operand.vmem [shape: bf16[16,128], index: 0, kind: input, shape index: {}]   ;;  %s695_s3 = inlined_call_operand.vmem [shape: f32[16,1], index: 3, kind: input, shape index: {}]   ;;  %s696_s2 = inlined_call_operand.vmem [shape: f32[16,1], index: 2, kind: input, shape index: {}]   ;;  %s697_s4 = inlined_call_operand.vmem [shape: bf16[16,512], index: 4, kind: output, shape index: {}]  }
   0x1   :  { %v491_v0 = vld [vmem:[%s693_s1 + $0xe4] ss:$16 sps:$4 sm:$0xff]   ;;  %250 = vmatprep.mubr.bf16.mxu0 %v544_v1  ;;  %293 = vmatprep.mubr.bf16.mxu1 %v544_v1  ;;  %v493_v2 = vld [vmem:[%s693_s1 + $0xec] ss:$16 sps:$4 sm:$0xff]   ;;  %v495_v3 = vld [vmem:[%s693_s1 + $0xe0] ss:$16 sps:$4 sm:$0xff]  }
   0x2   :  { %490 = vset.pattern.permute.xlu1 %v544_v1  ;;  %489 = vset.pattern.permute.xlu0 %v544_v1  ;;  %v496_v4 = vld [vmem:[%s693_s1 + $0xe8] ss:$16 sps:$4 sm:$0xff]   ;;  %v497_v5 = vld [vmem:[%s693_s1 + $0xc4] ss:$16 sps:$4 sm:$0xff]   ;;  %v499_v6 = vld [vmem:[%s693_s1 + $0xcc] ss:$16 sps:$4 sm:$0xff]  }
   0x3   :  { %218 = vmatprep.subr.bf16.mxu0 %v491_v0  ;;  %261 = vmatprep.subr.bf16.mxu1 %v493_v2  ;;  %v501_v7 = vld [vmem:[%s693_s1 + $0xc0] ss:$16 sps:$4 sm:$0xff]   ;;  %v502_v8 = vld [vmem:[%s693_s1 + $0xc8] ss:$16 sps:$4 sm:$0xff]   ;;  %v503_v9 = vld [vmem:[%s693_s1 + $0xa4] ss:$16 sps:$4 sm:$0xff]  }
   0x4   :  { %219 = vmatpush1.bf16.msra.mxu0 %v495_v3  ;;  %262 = vmatpush1.bf16.msra.mxu1 %v496_v4  ;;  %v505_v10 = vld [vmem:[%s693_s1 + $0xac] ss:$16 sps:$4 sm:$0xff]   ;;  %v507_v11 = vld [vmem:[%s693_s1 + $0xa0] ss:$16 sps:$4 sm:$0xff]   ;;  %v508_v12 = vld [vmem:[%s693_s1 + $0xa8] ss:$16 sps:$4 sm:$0xff]  }
   0x5   :  { %220 = vmatprep.subr.bf16.mxu0 %v497_v5  ;;  %263 = vmatprep.subr.bf16.mxu1 %v499_v6  ;;  %v509_v13 = vld [vmem:[%s693_s1 + $0x84] ss:$16 sps:$4 sm:$0xff]   ;;  %v511_v14 = vld [vmem:[%s693_s1 + $0x8c] ss:$16 sps:$4 sm:$0xff]   ;;  %v513_v15 = vld [vmem:[%s693_s1 + $0x80] ss:$16 sps:$4 sm:$0xff]  }
   0x6   :  { %v514_v16 = vld [vmem:[%s693_s1 + $0x88] ss:$16 sps:$4 sm:$0xff]   ;;  %v515_v17 = vld [vmem:[%s693_s1 + $0x64] ss:$16 sps:$4 sm:$0xff]   ;;  %v517_v18 = vld [vmem:[%s693_s1 + $0x6c] ss:$16 sps:$4 sm:$0xff]  }
   0x7   :  { %v519_v19 = vld [vmem:[%s693_s1 + $0x60] ss:$16 sps:$4 sm:$0xff]   ;;  %v520_v20 = vld [vmem:[%s693_s1 + $0x68] ss:$16 sps:$4 sm:$0xff]   ;;  %v521_v21 = vld [vmem:[%s693_s1 + $0x44] ss:$16 sps:$4 sm:$0xff]  }
   0x8   :  { %221 = vmatpush1.bf16.msra.mxu0 %v501_v7  ;;  %264 = vmatpush1.bf16.msra.mxu1 %v502_v8  ;;  %v523_v22 = vld [vmem:[%s693_s1 + $0x4c] ss:$16 sps:$4 sm:$0xff]   ;;  %v525_v23 = vld [vmem:[%s693_s1 + $0x40] ss:$16 sps:$4 sm:$0xff]   ;;  %v526_v24 = vld [vmem:[%s693_s1 + $0x48] ss:$16 sps:$4 sm:$0xff]  }
   0x9   :  { %222 = vmatprep.subr.bf16.mxu0 %v503_v9  ;;  %265 = vmatprep.subr.bf16.mxu1 %v505_v10  ;;  %v527_v25 = vld [vmem:[%s693_s1 + $0x24] ss:$16 sps:$4 sm:$0xff]   ;;  %v529_v26 = vld [vmem:[%s693_s1 + $0x2c] ss:$16 sps:$4 sm:$0xff]   ;;  %v531_v27 = vld [vmem:[%s693_s1 + $0x20] ss:$16 sps:$4 sm:$0xff]  }
   0xa   :  { %v532_v28 = vld [vmem:[%s693_s1 + $0x28] ss:$16 sps:$4 sm:$0xff]   ;;  %v533_v29 = vld [vmem:[%s693_s1 + $0x4] ss:$16 sps:$4 sm:$0xff]   ;;  %v535_v30 = vld [vmem:[%s693_s1 + $0xc] ss:$16 sps:$4 sm:$0xff]  }
   0xb   :  { %v537_v31 = vld [vmem:[%s693_s1] ss:$16 sps:$4 sm:$0xff]   ;;  %v538_v32 = vld [vmem:[%s693_s1 + $0x8] ss:$16 sps:$4 sm:$0xff]  }
   0xc   :  { %223 = vmatpush1.bf16.msra.mxu0 %v507_v11  ;;  %266 = vmatpush1.bf16.msra.mxu1 %v508_v12  ;;  %v539_v33 = vld [vmem:[%s694_s0] sm:$0xff]  }
   0xd   :  { %224 = vmatprep.subr.bf16.mxu0 %v509_v13  ;;  %267 = vmatprep.subr.bf16.mxu1 %v511_v14  ;;  %v371_v10 = vld [vmem:[%s695_s3] sm:$0xff] }
  0x10   :  { %225 = vmatpush1.bf16.msra.mxu0 %v513_v15  ;;  %268 = vmatpush1.bf16.msra.mxu1 %v514_v16 }
  0x11   :  { %226 = vmatprep.subr.bf16.mxu0 %v515_v17  ;;  %269 = vmatprep.subr.bf16.mxu1 %v517_v18  ;;  %v349_v17 = vld [vmem:[%s696_s2] sm:$0xff] }
  0x14   :  { %227 = vmatpush1.bf16.msra.mxu0 %v519_v19  ;;  %270 = vmatpush1.bf16.msra.mxu1 %v520_v20  ;;  %v350_v20 = vld [vmem:[%s696_s2 + $0x8] sm:$0xff] }
  0x15   :  { %228 = vmatprep.subr.bf16.mxu0 %v521_v21  ;;  %271 = vmatprep.subr.bf16.mxu1 %v523_v22 }
  0x18   :  { %229 = vmatpush1.bf16.msra.mxu0 %v525_v23  ;;  %272 = vmatpush1.bf16.msra.mxu1 %v526_v24  ;;  %v372_v23 = vld [vmem:[%s695_s3 + $0x8] sm:$0xff] }
  0x19   :  { %230 = vmatprep.subr.bf16.mxu0 %v527_v25  ;;  %273 = vmatprep.subr.bf16.mxu1 %v529_v26 }
  0x1c   :  { %231 = vmatpush1.bf16.msra.mxu0 %v531_v27  ;;  %274 = vmatpush1.bf16.msra.mxu1 %v532_v28 }
  0x1d   :  { %232 = vmatprep.subr.bf16.mxu0 %v533_v29  ;;  %275 = vmatprep.subr.bf16.mxu1 %v535_v30 }
  0x20   :  { %233 = vmatpush1.bf16.msra.mxu0 %v537_v31  ;;  %276 = vmatpush1.bf16.msra.mxu1 %v538_v32 }
  0x23   :  { %251 = vmatmul.mubr.bf16.vlgmr.msra.gmra.mxu0 %v539_v33  ;;  %294 = vmatmul.mubr.bf16.vlgmr.msra.gmra.mxu1 %v539_v33 }
  0xe3   :  { %v252_v34 = vpop.f32.mrf.mxu0  ;;  %v295_v35 = vpop.f32.mrf.mxu1 }
  0xe5   :  { %v254_v36 = vpop.f32.mrf.mxu0  ;;  %v297_v37 = vpop.f32.mrf.mxu1 }
  0xe6   :  { %v304_v38 = vadd.f32 %v254_v36, %v252_v34 }
  0xe7   :  { %v256_v39 = vpop.f32.mrf.mxu0  ;;  %v299_v41 = vpop.f32.mrf.mxu1 }
  0xe8   :  { %v305_v40 = vadd.f32 %v304_v38, %v295_v35 }
  0xe9   :  { %v258_v42 = vpop.f32.mrf.mxu0  ;;  %v301_v46 = vpop.f32.mrf.mxu1 }
  0xea   :  { %v309_v43 = vadd.f32 %v258_v42, %v256_v39  ;;  %v306_v44 = vadd.f32 %v305_v40, %v297_v37 }
  0xec   :  { %v310_v45 = vadd.f32 %v309_v43, %v299_v41  ;;  %307 = vadd.xlane.f32.xlu0 %v306_v44 }
  0xee   :  { %v311_v47 = vadd.f32 %v310_v45, %v301_v46 }
  0xf0   :  { %312 = vadd.xlane.f32.xlu0 %v311_v47 }
 0x175   :  { %v308_v48 = vpop.xlane.xlu0 %307 }
 0x176   :  { %v315_v49 = vmul.f32 0.001953125, %v308_v48 }
 0x178   :  { %v317_v50 = vsub.f32 %v252_v34, %v315_v49  ;;  %v318_v51 = vsub.f32 %v254_v36, %v315_v49  ;;  %v319_v52 = vsub.f32 %v295_v35, %v315_v49  ;;  %v320_v54 = vsub.f32 %v297_v37, %v315_v49 }
 0x179   :  { %v313_v53 = vpop.xlane.xlu0 %312 }
 0x17a   :  { %v316_v55 = vmul.f32 0.001953125, %v313_v53  ;;  %v325_v56 = vmul.f32 %v317_v50, %v317_v50  ;;  %v326_v57 = vmul.f32 %v318_v51, %v318_v51  ;;  %v327_v58 = vmul.f32 %v319_v52, %v319_v52 }
 0x17b   :  { %v328_v63 = vmul.f32 %v320_v54, %v320_v54 }
 0x17c   :  { %v321_v59 = vsub.f32 %v256_v39, %v316_v55  ;;  %v322_v60 = vsub.f32 %v258_v42, %v316_v55  ;;  %v333_v61 = vadd.f32 %v326_v57, %v325_v56  ;;  %v323_v62 = vsub.f32 %v299_v41, %v316_v55 }
 0x17d   :  { %v324_v1 = vsub.f32 %v301_v46, %v316_v55 }
 0x17e   :  { %v334_v0 = vadd.f32 %v333_v61, %v327_v58  ;;  %v329_v2 = vmul.f32 %v321_v59, %v321_v59  ;;  %v330_v3 = vmul.f32 %v322_v60, %v322_v60  ;;  %v331_v5 = vmul.f32 %v323_v62, %v323_v62 }
 0x17f   :  { %v332_v7 = vmul.f32 %v324_v1, %v324_v1 }
 0x180   :  { %v335_v4 = vadd.f32 %v334_v0, %v328_v63  ;;  %v338_v6 = vadd.f32 %v330_v3, %v329_v2 }
 0x182   :  { %336 = vadd.xlane.f32.xlu1 %v335_v4  ;;  %v339_v8 = vadd.f32 %v338_v6, %v331_v5 }
 0x184   :  { %v340_v9 = vadd.f32 %v339_v8, %v332_v7 }
 0x186   :  { %341 = vadd.xlane.f32.xlu1 %v340_v9 }
 0x197   :  { %375 = vperm.xlu1 %490, %v371_v10  }
 0x20b   :  { %v337_v11 = vpop.xlane.xlu1 %336 }
 0x20c   :  { %v343_v12 = vmul.f32 0.001953125, %v337_v11 }
 0x20e   :  { %v345_v13 = vadd.f32 1e-05, %v343_v12 }
 0x20f   :  { %v342_v14 = vpop.xlane.xlu1 %341 }
 0x210   :  { %540 = vrsqrt.f32 %v345_v13  ;;  %v344_v15 = vmul.f32 0.001953125, %v342_v14 }
 0x212   :  { %v346_v16 = vadd.f32 1e-05, %v344_v15 }
 0x213   :  { %v376_v24 = vpop.permute.xlu1 %375 }
 0x214   :  { %542 = vrsqrt.f32 %v346_v16 }
 0x21d   :  { %v541_v18 = vpop.eup %540 }
 0x21e   :  { %v351_v19 = vmul.f32 %v541_v18, %v349_v17 }
 0x220   :  { %355 = vperm.xlu0 %489, %v351_v19  }
 0x221   :  { %v543_v21 = vpop.eup %542 }
 0x222   :  { %v352_v22 = vmul.f32 %v543_v21, %v350_v20 }
 0x224   :  { %360 = vperm.xlu1 %490, %v352_v22  }
 0x228   :  { %380 = vperm.xlu1 %490, %v372_v23  }
 0x29b   :  { %v356_v25 = vpop.permute.xlu0 %355 }
 0x29c   :  { %v363_v26 = vmul.f32 %v356_v25, %v317_v50  ;;  %v364_v27 = vmul.f32 %v356_v25, %v318_v51  ;;  %v365_v28 = vmul.f32 %v356_v25, %v319_v52  ;;  %v366_v29 = vmul.f32 %v356_v25, %v320_v54 }
 0x29e   :  { %v383_v30 = vadd.f32 %v376_v24, %v363_v26  ;;  %v384_v31 = vadd.f32 %v376_v24, %v364_v27  ;;  %v385_v32 = vadd.f32 %v376_v24, %v365_v28  ;;  %v386_v33 = vadd.f32 %v376_v24, %v366_v29 }
 0x29f   :  { %v361_v34 = vpop.permute.xlu1 %360 }
 0x2a0   :  { %vm391_vm0 = vcmp.ge.f32.partialorder %v383_v30, 0.0  ;;  %vm392_vm1 = vcmp.ge.f32.partialorder %v384_v31, 0.0  ;;  %vm393_vm2 = vcmp.ge.f32.partialorder %v385_v32, 0.0  ;;  %vm394_vm3 = vcmp.ge.f32.partialorder %v386_v33, 0.0 }
 0x2a1   :  { %v399_v35 = vmul.f32 0.2, %v383_v30  ;;  %v400_v36 = vmul.f32 0.2, %v384_v31  ;;  %v401_v37 = vmul.f32 0.2, %v385_v32  ;;  %v367_v39 = vmul.f32 %v361_v34, %v321_v59 }
 0x2a2   :  { %v402_v38 = vmul.f32 0.2, %v386_v33  ;;  %v368_v40 = vmul.f32 %v361_v34, %v322_v60  ;;  %v369_v41 = vmul.f32 %v361_v34, %v323_v62  ;;  %v370_v45 = vmul.f32 %v361_v34, %v324_v1 }
 0x2a3   :  { %v407_v42 = vsel %vm391_vm0, %v383_v30, %v399_v35  ;;  %v408_v43 = vsel %vm392_vm1, %v384_v31, %v400_v36  ;;  %v409_v44 = vsel %vm393_vm2, %v385_v32, %v401_v37  ;;  %v381_v46 = vpop.permute.xlu1 %380 }
 0x2a4   :  { %v410_v47 = vsel %vm394_vm3, %v386_v33, %v402_v38  ;;  %v484_v48 = vpack.c.bf16 %v408_v43, %v407_v42  ;;  %v387_v49 = vadd.f32 %v381_v46, %v367_v39  ;;  %v388_v50 = vadd.f32 %v381_v46, %v368_v40 }
 0x2a5   :  { %v485_v51 = vpack.c.bf16 %v410_v47, %v409_v44  ;;  %v389_v52 = vadd.f32 %v381_v46, %v369_v41  ;;  %v390_v53 = vadd.f32 %v381_v46, %v370_v45 }
 0x2a6   :  { %439 = vst [vmem:[%s697_s4] sm:$0xff] %v484_v48  ;;  %vm395_vm4 = vcmp.ge.f32.partialorder %v387_v49, 0.0  ;;  %vm396_vm5 = vcmp.ge.f32.partialorder %v388_v50, 0.0  ;;  %v403_v54 = vmul.f32 0.2, %v387_v49  ;;  %v404_v55 = vmul.f32 0.2, %v388_v50 }
 0x2a7   :  { %440 = vst [vmem:[%s697_s4 + $0x8] sm:$0xff] %v485_v51  ;;  %vm397_vm6 = vcmp.ge.f32.partialorder %v389_v52, 0.0  ;;  %vm398_vm7 = vcmp.ge.f32.partialorder %v390_v53, 0.0  ;;  %v405_v56 = vmul.f32 0.2, %v389_v52 }
 0x2a8   :  { %v406_v57 = vmul.f32 0.2, %v390_v53  ;;  %v411_v58 = vsel %vm395_vm4, %v387_v49, %v403_v54  ;;  %v412_v59 = vsel %vm396_vm5, %v388_v50, %v404_v55 }
 0x2a9   :  { %v413_v60 = vsel %vm397_vm6, %v389_v52, %v405_v56  ;;  %v486_v62 = vpack.c.bf16 %v412_v59, %v411_v58 }
 0x2aa   :  { %v414_v61 = vsel %vm398_vm7, %v390_v53, %v406_v57 }
 0x2ab   :  { %v487_v63 = vpack.c.bf16 %v414_v61, %v413_v60  ;;  %441 = vst [vmem:[%s697_s4 + $0x10] sm:$0xff] %v486_v62 }
 0x2ad   :  { %442 = vst [vmem:[%s697_s4 + $0x18] sm:$0xff] %v487_v63 }

// kernel: discriminator_forward.6
= control target key start
LH: loop header
LB: loop body
LE: loop exit
PB: predicated region body
PF: predicated region fallthrough
CT: control target
= control target key end

     0   :  { %v472_v48 = vmov 0   ;;  %s608_s1 = inlined_call_operand.vmem [shape: bf16[256,128], index: 1, kind: input, shape index: {}]   ;;  %s609_s0 = inlined_call_operand.vmem [shape: bf16[32,256], index: 0, kind: input, shape index: {}]   ;;  %s610_s3 = inlined_call_operand.vmem [shape: f32[32,1], index: 3, kind: input, shape index: {}]   ;;  %s611_s2 = inlined_call_operand.vmem [shape: f32[32,1], index: 2, kind: input, shape index: {}]   ;;  %s612_s4 = inlined_call_operand.vmem [shape: bf16[32,128], index: 4, kind: output, shape index: {}]  }
   0x1   :  { %v442_v0 = vld [vmem:[%s608_s1 + $0x78] sm:$0xff]   ;;  %v444_v2 = vld [vmem:[%s608_s1 + $0x70] sm:$0xff]   ;;  %v446_v4 = vld [vmem:[%s608_s1 + $0x68] sm:$0xff]   ;;  %441 = vset.pattern.permute.xlu1 %v472_v48  ;;  %440 = vset.pattern.permute.xlu0 %v472_v48 }
   0x2   :  { %v443_v1 = vld [vmem:[%s608_s1 + $0x38] sm:$0xff]   ;;  %395 = vmatprep.subr.bf16.mxu0 %v442_v0  ;;  %423 = vmatprep.subr.bf16.mxu1 %v442_v0  ;;  %v445_v3 = vld [vmem:[%s608_s1 + $0x30] sm:$0xff]   ;;  %v447_v5 = vld [vmem:[%s608_s1 + $0x28] sm:$0xff]  }
   0x3   :  { %396 = vmatpush3.bf16.msra.mxu0 %v443_v1  ;;  %431 = vmatpush3.bf16.msra.mxu1 %v443_v1  ;;  %v448_v6 = vld [vmem:[%s608_s1 + $0x60] sm:$0xff]   ;;  %v450_v8 = vld [vmem:[%s608_s1 + $0x58] sm:$0xff]   ;;  %v452_v10 = vld [vmem:[%s608_s1 + $0x50] sm:$0xff]  }
   0x4   :  { %397 = vmatprep.subr.bf16.mxu0 %v444_v2  ;;  %424 = vmatprep.subr.bf16.mxu1 %v444_v2  ;;  %v449_v7 = vld [vmem:[%s608_s1 + $0x20] sm:$0xff]   ;;  %v451_v9 = vld [vmem:[%s608_s1 + $0x18] sm:$0xff]   ;;  %v453_v13 = vld [vmem:[%s608_s1 + $0x10] sm:$0xff]  }
   0x5   :  { %v460_v11 = vld [vmem:[%s609_s0 + $0x4] ss:$8 sps:$4 sm:$0xff]   ;;  %v463_v12 = vld [vmem:[%s609_s0 + $0x14] ss:$8 sps:$4 sm:$0xff]   ;;  %v458_v18 = vld [vmem:[%s609_s0] ss:$8 sps:$4 sm:$0xff]  }
   0x6   :  { %v454_v14 = vld [vmem:[%s608_s1 + $0x48] sm:$0xff]   ;;  %202 = vmatprep.mubr.bf16.mxu0 %v460_v11  ;;  %210 = vmatprep.mubr.bf16.mxu1 %v463_v12  ;;  %v456_v16 = vld [vmem:[%s608_s1 + $0x40] sm:$0xff]   ;;  %v461_v19 = vld [vmem:[%s609_s0 + $0x10] ss:$8 sps:$4 sm:$0xff]  }
   0x7   :  { %398 = vmatpush3.bf16.msra.mxu0 %v445_v3  ;;  %432 = vmatpush3.bf16.msra.mxu1 %v445_v3  ;;  %v455_v15 = vld [vmem:[%s608_s1 + $0x8] sm:$0xff]   ;;  %v457_v17 = vld [vmem:[%s608_s1] sm:$0xff]   ;;  %v294_v51 = vld [vmem:[%s610_s3 + $0x10] sm:$0xff] }
   0x8   :  { %399 = vmatprep.subr.bf16.mxu0 %v446_v4  ;;  %425 = vmatprep.subr.bf16.mxu1 %v446_v4  ;;  %v292_v49 = vld [vmem:[%s610_s3] sm:$0xff]  ;;  %v293_v50 = vld [vmem:[%s610_s3 + $0x8] sm:$0xff]  ;;  %v262_v3 = vld [vmem:[%s611_s2 + $0x10] sm:$0xff] }
   0x9   :  { %v260_v0 = vld [vmem:[%s611_s2] sm:$0xff]  ;;  %v295_v12 = vld [vmem:[%s610_s3 + $0x18] sm:$0xff] }
   0xb   :  { %400 = vmatpush3.bf16.msra.mxu0 %v447_v5  ;;  %433 = vmatpush3.bf16.msra.mxu1 %v447_v5 }
   0xc   :  { %401 = vmatprep.subr.bf16.mxu0 %v448_v6  ;;  %426 = vmatprep.subr.bf16.mxu1 %v448_v6 }
   0xf   :  { %402 = vmatpush3.bf16.msra.mxu0 %v449_v7  ;;  %434 = vmatpush3.bf16.msra.mxu1 %v449_v7  ;;  %v261_v7 = vld [vmem:[%s611_s2 + $0x8] sm:$0xff] }
  0x10   :  { %403 = vmatprep.subr.bf16.mxu0 %v450_v8  ;;  %427 = vmatprep.subr.bf16.mxu1 %v450_v8 }
  0x13   :  { %404 = vmatpush3.bf16.msra.mxu0 %v451_v9  ;;  %435 = vmatpush3.bf16.msra.mxu1 %v451_v9 }
  0x14   :  { %405 = vmatprep.subr.bf16.mxu0 %v452_v10  ;;  %428 = vmatprep.subr.bf16.mxu1 %v452_v10  ;;  %v263_v10 = vld [vmem:[%s611_s2 + $0x18] sm:$0xff] }
  0x17   :  { %406 = vmatpush3.bf16.msra.mxu0 %v453_v13  ;;  %436 = vmatpush3.bf16.msra.mxu1 %v453_v13 }
  0x18   :  { %407 = vmatprep.subr.bf16.mxu0 %v454_v14  ;;  %429 = vmatprep.subr.bf16.mxu1 %v454_v14 }
  0x1b   :  { %408 = vmatpush3.bf16.msra.mxu0 %v455_v15  ;;  %437 = vmatpush3.bf16.msra.mxu1 %v455_v15 }
  0x1c   :  { %409 = vmatprep.subr.bf16.mxu0 %v456_v16  ;;  %430 = vmatprep.subr.bf16.mxu1 %v456_v16 }
  0x1f   :  { %410 = vmatpush3.bf16.msra.mxu0 %v457_v17  ;;  %438 = vmatpush3.bf16.msra.mxu1 %v457_v17 }
  0x22   :  { %203 = vmatmul.mubr.bf16.vlgmr.msra.gmra.mxu0 %v458_v18  ;;  %211 = vmatmul.mubr.bf16.vlgmr.msra.gmra.mxu1 %v461_v19 }
  0xe2   :  { %v411_v20 = vpop.f32.mrf.mxu0  ;;  %v417_v21 = vpop.f32.mrf.mxu1 }
  0xe4   :  { %v412_v22 = vpop.f32.mrf.mxu0  ;;  %v418_v23 = vpop.f32.mrf.mxu1 }
  0xe5   :  { %v413_v24 = vadd.f32 %v412_v22, %v411_v20  ;;  %v419_v25 = vadd.f32 %v418_v23, %v417_v21 }
  0xe6   :  { %v414_v26 = vpop.f32.mrf.mxu0  ;;  %v420_v27 = vpop.f32.mrf.mxu1 }
  0xe7   :  { %223 = vadd.xlane.f32.xlu1 %v419_v25  ;;  %219 = vadd.xlane.f32.xlu0 %v413_v24 }
  0xe8   :  { %v415_v28 = vpop.f32.mrf.mxu0  ;;  %v421_v29 = vpop.f32.mrf.mxu1 }
  0xe9   :  { %v416_v30 = vadd.f32 %v415_v28, %v414_v26  ;;  %v422_v31 = vadd.f32 %v421_v29, %v420_v27 }
  0xeb   :  { %225 = vadd.xlane.f32.xlu1 %v422_v31  ;;  %221 = vadd.xlane.f32.xlu0 %v416_v30 }
 0x170   :  { %v224_v32 = vpop.xlane.xlu1 %223  ;;  %v220_v33 = vpop.xlane.xlu0 %219 }
 0x171   :  { %v230_v34 = vmul.f32 0.0078125, %v224_v32  ;;  %v228_v35 = vmul.f32 0.0078125, %v220_v33 }
 0x173   :  { %v558_v36 = vsub.f32 %v413_v24, %v228_v35  ;;  %v560_v39 = vsub.f32 %v419_v25, %v230_v34 }
 0x174   :  { %v226_v37 = vpop.xlane.xlu1 %225  ;;  %v222_v38 = vpop.xlane.xlu0 %221 }
 0x175   :  { %v231_v40 = vmul.f32 0.0078125, %v226_v37  ;;  %v229_v41 = vmul.f32 0.0078125, %v222_v38  ;;  %v236_v42 = vmul.f32 %v558_v36, %v558_v36  ;;  %v238_v45 = vmul.f32 %v560_v39, %v560_v39 }
 0x177   :  { %v564_v43 = vsub.f32 %v416_v30, %v229_v41  ;;  %240 = vadd.xlane.f32.xlu0 %v236_v42  ;;  %v566_v44 = vsub.f32 %v422_v31, %v231_v40 }
 0x179   :  { %v237_v46 = vmul.f32 %v564_v43, %v564_v43  ;;  %v239_v47 = vmul.f32 %v566_v44, %v566_v44 }
 0x17b   :  { %244 = vadd.xlane.f32.xlu0 %v238_v45  ;;  %242 = vadd.xlane.f32.xlu1 %v237_v46 }
 0x17f   :  { %246 = vadd.xlane.f32.xlu1 %v239_v47 }
 0x190   :  { %298 = vperm.xlu1 %441, %v292_v49  }
 0x194   :  { %303 = vperm.xlu1 %441, %v293_v50  }
 0x198   :  { %308 = vperm.xlu1 %441, %v294_v51  }
 0x200   :  { %v241_v52 = vpop.xlane.xlu0 %240 }
 0x201   :  { %v248_v53 = vmul.f32 0.0078125, %v241_v52 }
 0x203   :  { %v252_v54 = vadd.f32 1e-05, %v248_v53 }
 0x204   :  { %v243_v55 = vpop.xlane.xlu1 %242  ;;  %v245_v56 = vpop.xlane.xlu0 %244 }
 0x205   :  { %464 = vrsqrt.f32 %v252_v54  ;;  %v249_v57 = vmul.f32 0.0078125, %v243_v55  ;;  %v250_v58 = vmul.f32 0.0078125, %v245_v56 }
 0x207   :  { %v254_v59 = vadd.f32 1e-05, %v250_v58  ;;  %v253_v60 = vadd.f32 1e-05, %v249_v57 }
 0x208   :  { %v247_v61 = vpop.xlane.xlu1 %246 }
 0x209   :  { %v251_v62 = vmul.f32 0.0078125, %v247_v61  ;;  %466 = vrsqrt.f32 %v254_v59 }
 0x20a   :  { %468 = vrsqrt.f32 %v253_v60 }
 0x20b   :  { %v255_v63 = vadd.f32 1e-05, %v251_v62 }
 0x20c   :  { %v299_v13 = vpop.permute.xlu1 %298 }
 0x20d   :  { %470 = vrsqrt.f32 %v255_v63 }
 0x210   :  { %v304_v14 = vpop.permute.xlu1 %303 }
 0x212   :  { %v465_v1 = vpop.eup %464 }
 0x213   :  { %v264_v2 = vmul.f32 %v465_v1, %v260_v0 }
 0x214   :  { %v309_v15 = vpop.permute.xlu1 %308 }
 0x215   :  { %270 = vperm.xlu0 %440, %v264_v2  }
 0x216   :  { %v467_v4 = vpop.eup %466 }
 0x217   :  { %v266_v5 = vmul.f32 %v467_v4, %v262_v3  ;;  %v469_v6 = vpop.eup %468 }
 0x218   :  { %v265_v8 = vmul.f32 %v469_v6, %v261_v7 }
 0x219   :  { %280 = vperm.xlu1 %441, %v266_v5  }
 0x21a   :  { %v471_v9 = vpop.eup %470 }
 0x21b   :  { %v267_v11 = vmul.f32 %v471_v9, %v263_v10 }
 0x21d   :  { %275 = vperm.xlu1 %441, %v265_v8  }
 0x221   :  { %285 = vperm.xlu1 %441, %v267_v11  }
 0x225   :  { %313 = vperm.xlu1 %441, %v295_v12  }
 0x290   :  { %v271_v16 = vpop.permute.xlu0 %270 }
 0x291   :  { %v288_v17 = vmul.f32 %v271_v16, %v558_v36 }
 0x293   :  { %v316_v19 = vadd.f32 %v299_v13, %v288_v17 }
 0x294   :  { %v281_v18 = vpop.permute.xlu1 %280 }
 0x295   :  { %v290_v21 = vmul.f32 %v281_v18, %v560_v39  ;;  %v324_v23 = vmul.f32 0.2, %v316_v19  ;;  %vm320_vm0 = vcmp.ge.f32.partialorder %v316_v19, 0.0 }
 0x297   :  { %v318_v26 = vadd.f32 %v309_v15, %v290_v21  ;;  %v328_v28 = vsel %vm320_vm0, %v316_v19, %v324_v23 }
 0x298   :  { %v276_v20 = vpop.permute.xlu1 %275 }
 0x299   :  { %v289_v22 = vmul.f32 %v276_v20, %v564_v43  ;;  %v326_v33 = vmul.f32 0.2, %v318_v26  ;;  %vm322_vm2 = vcmp.ge.f32.partialorder %v318_v26, 0.0 }
 0x29b   :  { %v317_v24 = vadd.f32 %v304_v14, %v289_v22  ;;  %v330_v36 = vsel %vm322_vm2, %v318_v26, %v326_v33 }
 0x29c   :  { %v286_v25 = vpop.permute.xlu1 %285 }
 0x29d   :  { %vm321_vm1 = vcmp.ge.f32.partialorder %v317_v24, 0.0  ;;  %v325_v27 = vmul.f32 0.2, %v317_v24  ;;  %v291_v30 = vmul.f32 %v286_v25, %v566_v44 }
 0x29f   :  { %v329_v29 = vsel %vm321_vm1, %v317_v24, %v325_v27 }
 0x2a0   :  { %v387_v31 = vpack.c.bf16 %v329_v29, %v328_v28  ;;  %v314_v32 = vpop.permute.xlu1 %313 }
 0x2a1   :  { %v319_v34 = vadd.f32 %v314_v32, %v291_v30 }
 0x2a2   :  { %388 = vst [vmem:[%s612_s4] sm:$0xff] %v387_v31  }
 0x2a3   :  { %vm323_vm3 = vcmp.ge.f32.partialorder %v319_v34, 0.0  ;;  %v327_v35 = vmul.f32 0.2, %v319_v34 }
 0x2a5   :  { %v331_v37 = vsel %vm323_vm3, %v319_v34, %v327_v35 }
 0x2a6   :  { %v392_v38 = vpack.c.bf16 %v331_v37, %v330_v36 }
 0x2a8   :  { %394 = vst [vmem:[%s612_s4 + $0x8] sm:$0xff] %v392_v38  }

// kernel: discriminator_forward.7
= control target key start
LH: loop header
LB: loop body
LE: loop exit
PB: predicated region body
PF: predicated region fallthrough
CT: control target
= control target key end

     0   :  { %s1620_s0 = inlined_call_operand.vmem [shape: bf16[64,512], index: 0, kind: input, shape index: {}]   ;;  %s1621_s1 = inlined_call_operand.vmem [shape: bf16[512,32], index: 1, kind: input, shape index: {}]   ;;  %s1622_s2 = inlined_call_operand.vmem [shape: f32[64,1], index: 2, kind: input, shape index: {}]   ;;  %s1623_s3 = inlined_call_operand.vmem [shape: f32[64,1], index: 3, kind: input, shape index: {}]   ;;  %s1624_s4 = inlined_call_operand.vmem [shape: bf16[64,32], index: 4, kind: input, shape index: {}]   ;;  %s1625_s5 = inlined_call_operand.vmem [shape: f32[32,2], index: 5, kind: input, shape index: {}]   ;;  %s1626_s6 = inlined_call_operand.<no memory space> [shape: f32[1,1], index: 6, kind: input, shape index: {}]   ;;  %s1627_s7 = inlined_call_operand.hbm [shape: f32[1,2], index: 7, kind: output, shape index: {}]  }
   0x1   :  { %v12_v0 = vstv %s1626_s6 }
   0x2   :  { %13 = vst [vmem:[#allocation2] sm:$0x1] %v12_v0 }
   0x3   :  { %v1178_v1 = vld [vmem:[%s1621_s1 + $0x78] sm:$0xff]   ;;  %v1182_v5 = vld [vmem:[%s1621_s1 + $0x70] sm:$0xff]   ;;  %v1186_v9 = vld [vmem:[%s1621_s1 + $0x68] sm:$0xff]  }
   0x4   :  { %v1179_v2 = vld [vmem:[%s1621_s1 + $0xf8] sm:$0xff]   ;;  %1054 = vmatprep.subr.bf16.mxu0 %v1178_v1  ;;  %v1183_v6 = vld [vmem:[%s1621_s1 + $0xf0] sm:$0xff]   ;;  %v1187_v10 = vld [vmem:[%s1621_s1 + $0xe8] sm:$0xff]  }
   0x5   :  { %v1180_v3 = vld [vmem:[%s1621_s1 + $0x38] sm:$0xff]   ;;  %1094 = vmatprep.subr.bf16.mxu1 %v1179_v2  ;;  %v1184_v7 = vld [vmem:[%s1621_s1 + $0x30] sm:$0xff]   ;;  %v1188_v11 = vld [vmem:[%s1621_s1 + $0x28] sm:$0xff]  }
   0x6   :  { %v1181_v4 = vld [vmem:[%s1621_s1 + $0xb8] sm:$0xff]   ;;  %1055 = vmatpush3.bf16.msra.mxu0 %v1180_v3  ;;  %v1185_v8 = vld [vmem:[%s1621_s1 + $0xb0] sm:$0xff]   ;;  %v1189_v12 = vld [vmem:[%s1621_s1 + $0xa8] sm:$0xff]  }
   0x7   :  { %1095 = vmatpush3.bf16.msra.mxu1 %v1181_v4  ;;  %1056 = vmatprep.subr.bf16.mxu0 %v1182_v5  ;;  %v1190_v13 = vld [vmem:[%s1621_s1 + $0x60] sm:$0xff]   ;;  %v1194_v17 = vld [vmem:[%s1621_s1 + $0x58] sm:$0xff]   ;;  %v1198_v21 = vld [vmem:[%s1621_s1 + $0x50] sm:$0xff]  }
   0x8   :  { %1096 = vmatprep.subr.bf16.mxu1 %v1183_v6  ;;  %v1191_v14 = vld [vmem:[%s1621_s1 + $0xe0] sm:$0xff]   ;;  %v1195_v18 = vld [vmem:[%s1621_s1 + $0xd8] sm:$0xff]   ;;  %v1199_v22 = vld [vmem:[%s1621_s1 + $0xd0] sm:$0xff]  }
   0x9   :  { %v1192_v15 = vld [vmem:[%s1621_s1 + $0x20] sm:$0xff]   ;;  %v1196_v19 = vld [vmem:[%s1621_s1 + $0x18] sm:$0xff]   ;;  %v1200_v23 = vld [vmem:[%s1621_s1 + $0x10] sm:$0xff]  }
   0xa   :  { %1057 = vmatpush3.bf16.msra.mxu0 %v1184_v7  ;;  %v1193_v16 = vld [vmem:[%s1621_s1 + $0xa0] sm:$0xff]   ;;  %v1197_v20 = vld [vmem:[%s1621_s1 + $0x98] sm:$0xff]   ;;  %v1201_v24 = vld [vmem:[%s1621_s1 + $0x90] sm:$0xff]  }
   0xb   :  { %1097 = vmatpush3.bf16.msra.mxu1 %v1185_v8  ;;  %1058 = vmatprep.subr.bf16.mxu0 %v1186_v9  ;;  %v1202_v25 = vld [vmem:[%s1621_s1 + $0x48] sm:$0xff]   ;;  %v1206_v29 = vld [vmem:[%s1621_s1 + $0x40] sm:$0xff]  }
   0xc   :  { %1098 = vmatprep.subr.bf16.mxu1 %v1187_v10  ;;  %v1203_v26 = vld [vmem:[%s1621_s1 + $0xc8] sm:$0xff]   ;;  %v1207_v30 = vld [vmem:[%s1621_s1 + $0xc0] sm:$0xff]  }
   0xd   :  { %v1204_v27 = vld [vmem:[%s1621_s1 + $0x8] sm:$0xff]   ;;  %v1208_v31 = vld [vmem:[%s1621_s1] sm:$0xff]  }
   0xe   :  { %1059 = vmatpush3.bf16.msra.mxu0 %v1188_v11  ;;  %v1205_v28 = vld [vmem:[%s1621_s1 + $0x88] sm:$0xff]   ;;  %v1209_v32 = vld [vmem:[%s1621_s1 + $0x80] sm:$0xff]  }
   0xf   :  { %1099 = vmatpush3.bf16.msra.mxu1 %v1189_v12  ;;  %1060 = vmatprep.subr.bf16.mxu0 %v1190_v13  ;;  %v1210_v33 = vld [vmem:[%s1620_s0] ss:$16 sps:$4 sm:$0xff]   ;;  %v1212_v34 = vld [vmem:[%s1620_s0 + $0x4] ss:$16 sps:$4 sm:$0xff]   ;;  %v1213_v35 = vld [vmem:[%s1620_s0 + $0x8] ss:$16 sps:$4 sm:$0xff]  }
  0x10   :  { %1100 = vmatprep.subr.bf16.mxu1 %v1191_v14  ;;  %v1215_v36 = vld [vmem:[%s1620_s0 + $0xc] ss:$16 sps:$4 sm:$0xff]   ;;  %414 = vmatprep.mubr.bf16.mxu0 %v1212_v34  ;;  %v1216_v37 = vld [vmem:[%s1620_s0 + $0x24] ss:$16 sps:$4 sm:$0xff]   ;;  %v1220_v39 = vld [vmem:[%s1620_s0 + $0x20] ss:$16 sps:$4 sm:$0xff]  }
  0x11   :  { %479 = vmatprep.mubr.bf16.mxu1 %v1215_v36  ;;  %v1218_v38 = vld [vmem:[%s1620_s0 + $0x2c] ss:$16 sps:$4 sm:$0xff]   ;;  %v1221_v40 = vld [vmem:[%s1620_s0 + $0x28] ss:$16 sps:$4 sm:$0xff]   ;;  %v1222_v41 = vld [vmem:[%s1620_s0 + $0x44] ss:$16 sps:$4 sm:$0xff]  }
  0x12   :  { %1061 = vmatpush3.bf16.msra.mxu0 %v1192_v15  ;;  %v1224_v42 = vld [vmem:[%s1620_s0 + $0x4c] ss:$16 sps:$4 sm:$0xff]  }
  0x13   :  { %1101 = vmatpush3.bf16.msra.mxu1 %v1193_v16  ;;  %1062 = vmatprep.subr.bf16.mxu0 %v1194_v17 }
  0x14   :  { %1102 = vmatprep.subr.bf16.mxu1 %v1195_v18 }
  0x16   :  { %1063 = vmatpush3.bf16.msra.mxu0 %v1196_v19 }
  0x17   :  { %1103 = vmatpush3.bf16.msra.mxu1 %v1197_v20  ;;  %1064 = vmatprep.subr.bf16.mxu0 %v1198_v21 }
  0x18   :  { %1104 = vmatprep.subr.bf16.mxu1 %v1199_v22 }
  0x1a   :  { %1065 = vmatpush3.bf16.msra.mxu0 %v1200_v23 }
  0x1b   :  { %1105 = vmatpush3.bf16.msra.mxu1 %v1201_v24  ;;  %1066 = vmatprep.subr.bf16.mxu0 %v1202_v25 }
  0x1c   :  { %1106 = vmatprep.subr.bf16.mxu1 %v1203_v26 }
  0x1e   :  { %1067 = vmatpush3.bf16.msra.mxu0 %v1204_v27 }
  0x1f   :  { %1107 = vmatpush3.bf16.msra.mxu1 %v1205_v28  ;;  %1068 = vmatprep.subr.bf16.mxu0 %v1206_v29 }
  0x20   :  { %1108 = vmatprep.subr.bf16.mxu1 %v1207_v30 }
  0x22   :  { %1069 = vmatpush3.bf16.msra.mxu0 %v1208_v31 }
  0x23   :  { %1109 = vmatpush3.bf16.msra.mxu1 %v1209_v32 }
  0x25   :  { %415 = vmatmul.mubr.bf16.vlgmr.msra.gmra.mxu0 %v1210_v33 }
  0x26   :  { %480 = vmatmul.mubr.bf16.vlgmr.msra.gmra.mxu1 %v1213_v35  ;;  %422 = vmatprep.mubr.bf16.mxu0 %v1216_v37 }
  0x27   :  { %487 = vmatprep.mubr.bf16.mxu1 %v1218_v38 }
  0x28   :  { %14 = vsyncpa [#allocation4], 0  ;;  %v1226_v43 = vld [vmem:[%s1620_s0 + $0x40] ss:$16 sps:$4 sm:$0xff]   ;;  %v1227_v44 = vld [vmem:[%s1620_s0 + $0x48] ss:$16 sps:$4 sm:$0xff]  }
  0x29   :  { %v1228_v45 = vld [vmem:[%s1620_s0 + $0x64] ss:$16 sps:$4 sm:$0xff]   ;;  %v1230_v46 = vld [vmem:[%s1620_s0 + $0x6c] ss:$16 sps:$4 sm:$0xff]   ;;  %v1232_v47 = vld [vmem:[%s1620_s0 + $0x60] ss:$16 sps:$4 sm:$0xff]  }
  0x2a   :  { %v1233_v48 = vld [vmem:[%s1620_s0 + $0x68] ss:$16 sps:$4 sm:$0xff]   ;;  %vm512_vm0 = vcmask 261120   ;;  %vm923_vm9 = vcmask 15360   ;;  %vm962_vm10 = vcmask 8192  }
  0x2d   :  { %423 = vmatmul.mubr.bf16.gmra.mxu0 %v1220_v39 }
  0x2e   :  { %488 = vmatmul.mubr.bf16.gmra.mxu1 %v1221_v40  ;;  %430 = vmatprep.mubr.bf16.mxu0 %v1222_v41 }
  0x2f   :  { %495 = vmatprep.mubr.bf16.mxu1 %v1224_v42 }
  0x35   :  { %431 = vmatmul.mubr.bf16.gmra.mxu0 %v1226_v43 }
  0x36   :  { %496 = vmatmul.mubr.bf16.gmra.mxu1 %v1227_v44  ;;  %438 = vmatprep.mubr.bf16.mxu0 %v1228_v45 }
  0x37   :  { %503 = vmatprep.mubr.bf16.mxu1 %v1230_v46 }
  0x3d   :  { %439 = vmatmul.mubr.bf16.gmra.mxu0 %v1232_v47 }
  0x3e   :  { %504 = vmatmul.mubr.bf16.gmra.mxu1 %v1233_v48 }
  0xe5   :  { %v1070_v49 = vpop.f32.mrf.mxu0 }
  0xe6   :  { %v1110_v50 = vpop.f32.mrf.mxu1 }
  0xe7   :  { %v1071_v51 = vpop.f32.mrf.mxu0 }
  0xe8   :  { %v1072_v52 = vadd.f32 %v1071_v51, %v1070_v49  ;;  %v1111_v53 = vpop.f32.mrf.mxu1  ;;  %v1276_v49 = vmov 0  }
  0xe9   :  { %v1112_v54 = vadd.f32 %v1111_v53, %v1110_v50  ;;  %v1073_v55 = vpop.f32.mrf.mxu0  ;;  %1176 = vset.pattern.permute.xlu1 %v1276_v49  ;;  %1177 = vset.pattern.permute.xlu0 %v1276_v49 }
  0xea   :  { %v1113_v56 = vpop.f32.mrf.mxu1 }
  0xeb   :  { %v1074_v57 = vpop.f32.mrf.mxu0  ;;  %v1465_v58 = vadd.f32 %v1112_v54, %v1072_v52 }
  0xec   :  { %v1075_v59 = vadd.f32 %v1074_v57, %v1073_v55  ;;  %v1114_v60 = vpop.f32.mrf.mxu1 }
  0xed   :  { %v1115_v61 = vadd.f32 %v1114_v60, %v1113_v56  ;;  %v1076_v62 = vpop.f32.mrf.mxu0  ;;  %v513_v63 = vsel %vm512_vm0, %v1465_v58, 0.0 }
  0xee   :  { %v1116_v0 = vpop.f32.mrf.mxu1  ;;  %514 = vadd.xlane.f32.xlu0 %v513_v63 }
  0xef   :  { %v1077_v1 = vpop.f32.mrf.mxu0  ;;  %v1469_v2 = vadd.f32 %v1115_v61, %v1075_v59 }
  0xf0   :  { %v1078_v3 = vadd.f32 %v1077_v1, %v1076_v62  ;;  %v1117_v4 = vpop.f32.mrf.mxu1 }
  0xf1   :  { %v1118_v5 = vadd.f32 %v1117_v4, %v1116_v0  ;;  %v1079_v6 = vpop.f32.mrf.mxu0  ;;  %v516_v7 = vsel %vm512_vm0, %v1469_v2, 0.0 }
  0xf2   :  { %v1119_v8 = vpop.f32.mrf.mxu1  ;;  %517 = vadd.xlane.f32.xlu0 %v516_v7 }
  0xf3   :  { %v1080_v9 = vpop.f32.mrf.mxu0  ;;  %v490_v10 = vadd.f32 %v1118_v5, %v1078_v3 }
  0xf4   :  { %v1081_v11 = vadd.f32 %v1080_v9, %v1079_v6  ;;  %v1120_v12 = vpop.f32.mrf.mxu1 }
  0xf5   :  { %v1121_v13 = vadd.f32 %v1120_v12, %v1119_v8  ;;  %v1082_v14 = vpop.f32.mrf.mxu0  ;;  %v519_v15 = vsel %vm512_vm0, %v490_v10, 0.0 }
  0xf6   :  { %v1122_v16 = vpop.f32.mrf.mxu1  ;;  %520 = vadd.xlane.f32.xlu1 %v519_v15 }
  0xf7   :  { %v1083_v17 = vpop.f32.mrf.mxu0  ;;  %v493_v18 = vadd.f32 %v1121_v13, %v1081_v11 }
  0xf8   :  { %v1084_v19 = vadd.f32 %v1083_v17, %v1082_v14  ;;  %v1123_v20 = vpop.f32.mrf.mxu1 }
  0xf9   :  { %v1124_v21 = vadd.f32 %v1123_v20, %v1122_v16  ;;  %v1085_v22 = vpop.f32.mrf.mxu0  ;;  %v522_v23 = vsel %vm512_vm0, %v493_v18, 0.0 }
  0xfa   :  { %v1125_v24 = vpop.f32.mrf.mxu1  ;;  %523 = vadd.xlane.f32.xlu1 %v522_v23 }
  0xfb   :  { %v1086_v25 = vpop.f32.mrf.mxu0  ;;  %v498_v26 = vadd.f32 %v1124_v21, %v1084_v19 }
  0xfc   :  { %v1087_v27 = vadd.f32 %v1086_v25, %v1085_v22  ;;  %v1126_v28 = vpop.f32.mrf.mxu1 }
  0xfd   :  { %v1127_v29 = vadd.f32 %v1126_v28, %v1125_v24  ;;  %v1088_v30 = vpop.f32.mrf.mxu0  ;;  %v525_v31 = vsel %vm512_vm0, %v498_v26, 0.0  ;;  %v676_v28 = vld [vmem:[%s1623_s3 + $0x10] sm:$0xff] }
  0xfe   :  { %v1128_v32 = vpop.f32.mrf.mxu1  ;;  %526 = vadd.xlane.f32.xlu0 %v525_v31  ;;  %v793_v31 = vld [vmem:[%s1625_s5 + $0x18] sm:$0xff] }
  0xff   :  { %v1089_v33 = vpop.f32.mrf.mxu0  ;;  %v501_v34 = vadd.f32 %v1127_v29, %v1087_v27  ;;  %v675_v27 = vld [vmem:[%s1623_s3 + $0x8] sm:$0xff]  ;;  %v677_v29 = vld [vmem:[%s1623_s3 + $0x18] sm:$0xff]  ;;  %1146 = vmatprep.subr.mxu0 %v793_v31  ;;  %1166 = vmatprep.subr.mxu1 %v793_v31 }
 0x100   :  { %v1090_v35 = vadd.f32 %v1089_v33, %v1088_v30  ;;  %v1129_v36 = vpop.f32.mrf.mxu1  ;;  %v678_v30 = vld [vmem:[%s1623_s3 + $0x20] sm:$0xff]  ;;  %1147 = vmatpush3.msra.mxu0 %v793_v31  ;;  %1170 = vmatpush3.msra.mxu1 %v793_v31 }
 0x101   :  { %v1130_v37 = vadd.f32 %v1129_v36, %v1128_v32  ;;  %v1091_v38 = vpop.f32.mrf.mxu0  ;;  %v528_v39 = vsel %vm512_vm0, %v501_v34, 0.0 }
 0x102   :  { %v1131_v40 = vpop.f32.mrf.mxu1  ;;  %529 = vadd.xlane.f32.xlu1 %v528_v39 }
 0x103   :  { %v1092_v41 = vpop.f32.mrf.mxu0  ;;  %v506_v42 = vadd.f32 %v1130_v37, %v1090_v35 }
 0x104   :  { %v1093_v43 = vadd.f32 %v1092_v41, %v1091_v38  ;;  %v1132_v44 = vpop.f32.mrf.mxu1 }
 0x105   :  { %v1133_v45 = vadd.f32 %v1132_v44, %v1131_v40  ;;  %v531_v46 = vsel %vm512_vm0, %v506_v42, 0.0 }
 0x106   :  { %532 = vadd.xlane.f32.xlu0 %v531_v46 }
 0x107   :  { %v509_v47 = vadd.f32 %v1133_v45, %v1093_v43  ;;  %v610_v45 = vld [vmem:[%s1622_s2] sm:$0xff] }
 0x109   :  { %v534_v48 = vsel %vm512_vm0, %v509_v47, 0.0 }
 0x10a   :  { %535 = vadd.xlane.f32.xlu1 %v534_v48 }
 0x177   :  { %v515_v50 = vpop.xlane.xlu0 %514 }
 0x178   :  { %v538_v51 = vmul.f32 0.03125, %v515_v50 }
 0x17a   :  { %v1480_v52 = vsub.f32 %v1465_v58, %v538_v51  ;;  %v611_v51 = vld [vmem:[%s1622_s2 + $0x8] sm:$0xff] }
 0x17b   :  { %v518_v53 = vpop.xlane.xlu0 %517 }
 0x17c   :  { %v539_v54 = vmul.f32 0.03125, %v518_v53  ;;  %v554_v55 = vmul.f32 %v1480_v52, %v1480_v52 }
 0x17e   :  { %v1485_v56 = vsub.f32 %v1469_v2, %v539_v54  ;;  %v562_v57 = vsel %vm512_vm0, %v554_v55, 0.0  ;;  %v679_v55 = vld [vmem:[%s1623_s3 + $0x28] sm:$0xff] }
 0x17f   :  { %v521_v59 = vpop.xlane.xlu1 %520  ;;  %563 = vadd.xlane.f32.xlu0 %v562_v57 }
 0x180   :  { %v540_v60 = vmul.f32 0.03125, %v521_v59  ;;  %v555_v61 = vmul.f32 %v1485_v56, %v1485_v56 }
 0x182   :  { %v1490_v62 = vsub.f32 %v490_v10, %v540_v60  ;;  %v565_v58 = vsel %vm512_vm0, %v555_v61, 0.0  ;;  %v612_v61 = vld [vmem:[%s1622_s2 + $0x10] sm:$0xff] }
 0x183   :  { %v524_v63 = vpop.xlane.xlu1 %523  ;;  %566 = vadd.xlane.f32.xlu1 %v565_v58 }
 0x184   :  { %v541_v0 = vmul.f32 0.03125, %v524_v63  ;;  %v556_v1 = vmul.f32 %v1490_v62, %v1490_v62 }
 0x186   :  { %v1495_v2 = vsub.f32 %v493_v18, %v541_v0  ;;  %v568_v3 = vsel %vm512_vm0, %v556_v1, 0.0 }
 0x187   :  { %569 = vadd.xlane.f32.xlu0 %v568_v3  ;;  %v527_v4 = vpop.xlane.xlu0 %526 }
 0x188   :  { %v542_v5 = vmul.f32 0.03125, %v527_v4  ;;  %v557_v6 = vmul.f32 %v1495_v2, %v1495_v2  ;;  %v613_v4 = vld [vmem:[%s1622_s2 + $0x18] sm:$0xff] }
 0x18a   :  { %v1500_v7 = vsub.f32 %v498_v26, %v542_v5  ;;  %v571_v8 = vsel %vm512_vm0, %v557_v6, 0.0  ;;  %v674_v26 = vld [vmem:[%s1623_s3] sm:$0xff]  ;;  %v792_v5 = vld [vmem:[%s1625_s5 + $0x10] sm:$0xff] }
 0x18b   :  { %v530_v9 = vpop.xlane.xlu1 %529  ;;  %572 = vadd.xlane.f32.xlu1 %v571_v8  ;;  %1148 = vmatprep.subr.mxu0 %v792_v5 }
 0x18c   :  { %v543_v10 = vmul.f32 0.03125, %v530_v9  ;;  %v558_v11 = vmul.f32 %v1500_v7, %v1500_v7  ;;  %1149 = vmatpush3.msra.mxu0 %v792_v5  ;;  %v791_v9 = vld [vmem:[%s1625_s5 + $0x8] sm:$0xff]  ;;  %1167 = vmatprep.subr.mxu1 %v792_v5 }
 0x18d   :  { %1150 = vmatprep.subr.mxu0 %v791_v9  ;;  %1171 = vmatpush3.msra.mxu1 %v792_v5 }
 0x18e   :  { %v1505_v12 = vsub.f32 %v501_v34, %v543_v10  ;;  %v574_v13 = vsel %vm512_vm0, %v558_v11, 0.0  ;;  %1151 = vmatpush3.msra.mxu0 %v791_v9  ;;  %1168 = vmatprep.subr.mxu1 %v791_v9 }
 0x18f   :  { %575 = vadd.xlane.f32.xlu0 %v574_v13  ;;  %v533_v14 = vpop.xlane.xlu0 %532  ;;  %v614_v13 = vld [vmem:[%s1622_s2 + $0x20] sm:$0xff]  ;;  %1172 = vmatpush3.msra.mxu1 %v791_v9 }
 0x190   :  { %v544_v15 = vmul.f32 0.03125, %v533_v14  ;;  %v559_v16 = vmul.f32 %v1505_v12, %v1505_v12  ;;  %v790_v14 = vld [vmem:[%s1625_s5] sm:$0xff] }
 0x191   :  { %1152 = vmatprep.subr.mxu0 %v790_v14  ;;  %1169 = vmatprep.subr.mxu1 %v790_v14 }
 0x192   :  { %v1510_v17 = vsub.f32 %v506_v42, %v544_v15  ;;  %v577_v18 = vsel %vm512_vm0, %v559_v16, 0.0  ;;  %1153 = vmatpush3.msra.mxu0 %v790_v14  ;;  %1173 = vmatpush3.msra.mxu1 %v790_v14 }
 0x193   :  { %v536_v19 = vpop.xlane.xlu1 %535  ;;  %578 = vadd.xlane.f32.xlu1 %v577_v18  ;;  %v615_v18 = vld [vmem:[%s1622_s2 + $0x28] sm:$0xff] }
 0x194   :  { %v545_v20 = vmul.f32 0.03125, %v536_v19  ;;  %v560_v21 = vmul.f32 %v1510_v17, %v1510_v17 }
 0x196   :  { %v1515_v22 = vsub.f32 %v509_v47, %v545_v20  ;;  %v580_v23 = vsel %vm512_vm0, %v560_v21, 0.0  ;;  %v616_v21 = vld [vmem:[%s1622_s2 + $0x30] sm:$0xff] }
 0x197   :  { %581 = vadd.xlane.f32.xlu0 %v580_v23 }
 0x198   :  { %v561_v24 = vmul.f32 %v1515_v22, %v1515_v22 }
 0x19a   :  { %v583_v25 = vsel %vm512_vm0, %v561_v24, 0.0 }
 0x19b   :  { %584 = vadd.xlane.f32.xlu1 %v583_v25  ;;  %v617_v25 = vld [vmem:[%s1622_s2 + $0x38] sm:$0xff] }
 0x1ac   :  { %684 = vperm.xlu1 %1176, %v674_v26  }
 0x1b0   :  { %689 = vperm.xlu1 %1176, %v675_v27   ;;  %v680_v27 = vld [vmem:[%s1623_s3 + $0x30] sm:$0xff] }
 0x1b4   :  { %694 = vperm.xlu1 %1176, %v676_v28  }
 0x1b8   :  { %699 = vperm.xlu1 %1176, %v677_v29   ;;  %v681_v29 = vld [vmem:[%s1623_s3 + $0x38] sm:$0xff] }
 0x1bc   :  { %704 = vperm.xlu1 %1176, %v678_v30   ;;  %v945_v30 = vld [vmem:[#allocation2] sm:$0x1] }
 0x208   :  { %v564_v32 = vpop.xlane.xlu0 %563 }
 0x209   :  { %v586_v33 = vmul.f32 0.03125, %v564_v32 }
 0x20b   :  { %v594_v34 = vadd.f32 1e-05, %v586_v33 }
 0x20c   :  { %v567_v35 = vpop.xlane.xlu1 %566 }
 0x20d   :  { %1234 = vrsqrt.f32 %v594_v34  ;;  %v587_v36 = vmul.f32 0.03125, %v567_v35 }
 0x20f   :  { %v595_v37 = vadd.f32 1e-05, %v587_v36 }
 0x210   :  { %v570_v38 = vpop.xlane.xlu0 %569 }
 0x211   :  { %1236 = vrsqrt.f32 %v595_v37  ;;  %v588_v39 = vmul.f32 0.03125, %v570_v38 }
 0x213   :  { %v596_v40 = vadd.f32 1e-05, %v588_v39 }
 0x214   :  { %v573_v41 = vpop.xlane.xlu1 %572 }
 0x215   :  { %1238 = vrsqrt.f32 %v596_v40  ;;  %v589_v42 = vmul.f32 0.03125, %v573_v41 }
 0x217   :  { %v597_v43 = vadd.f32 1e-05, %v589_v42 }
 0x218   :  { %v576_v44 = vpop.xlane.xlu0 %575 }
 0x219   :  { %1240 = vrsqrt.f32 %v597_v43  ;;  %v590_v46 = vmul.f32 0.03125, %v576_v44 }
 0x21a   :  { %v1235_v47 = vpop.eup %1234 }
 0x21b   :  { %v598_v48 = vadd.f32 1e-05, %v590_v46  ;;  %v618_v49 = vmul.f32 %v1235_v47, %v610_v45  ;;  %v1036_v46 = vld [vmem:[%s1624_s4] sm:$0xff]  }
 0x21c   :  { %v579_v50 = vpop.xlane.xlu1 %578 }
 0x21d   :  { %1242 = vrsqrt.f32 %v598_v48  ;;  %v591_v53 = vmul.f32 0.03125, %v579_v50  ;;  %628 = vperm.xlu0 %1177, %v618_v49  }
 0x21e   :  { %v1237_v54 = vpop.eup %1236 }
 0x21f   :  { %v599_v57 = vadd.f32 1e-05, %v591_v53  ;;  %v619_v59 = vmul.f32 %v1237_v54, %v611_v51  ;;  %v1037_v51 = vunpack.c.l.bf16 %v1036_v46  ;;  %v1038_v53 = vunpack.c.h.bf16 %v1036_v46 }
 0x220   :  { %v582_v60 = vpop.xlane.xlu0 %581 }
 0x221   :  { %1244 = vrsqrt.f32 %v599_v57  ;;  %v592_v58 = vmul.f32 0.03125, %v582_v60  ;;  %633 = vperm.xlu1 %1176, %v619_v59   ;;  %709 = vperm.xlu0 %1177, %v679_v55  }
 0x222   :  { %v1239_v63 = vpop.eup %1238 }
 0x223   :  { %v600_v0 = vadd.f32 1e-05, %v592_v58  ;;  %v620_v1 = vmul.f32 %v1239_v63, %v612_v61 }
 0x224   :  { %v585_v3 = vpop.xlane.xlu1 %584 }
 0x225   :  { %1246 = vrsqrt.f32 %v600_v0  ;;  %v593_v6 = vmul.f32 0.03125, %v585_v3  ;;  %638 = vperm.xlu1 %1176, %v620_v1   ;;  %v1051_v1 = vld [vmem:[%s1624_s4 + $0x8] sm:$0xff]  }
 0x226   :  { %v1241_v8 = vpop.eup %1240  ;;  %v1042_v9 = vunpack.c.h.bf16 %v1051_v1 }
 0x227   :  { %v601_v10 = vadd.f32 1e-05, %v593_v6  ;;  %v621_v11 = vmul.f32 %v1241_v8, %v613_v4  ;;  %v1041_v8 = vunpack.c.l.bf16 %v1051_v1 }
 0x228   :  { %v685_v31 = vpop.permute.xlu1 %684 }
 0x229   :  { %1248 = vrsqrt.f32 %v601_v10  ;;  %643 = vperm.xlu1 %1176, %v621_v11  }
 0x22a   :  { %v1243_v15 = vpop.eup %1242 }
 0x22b   :  { %v622_v16 = vmul.f32 %v1243_v15, %v614_v13 }
 0x22c   :  { %v690_v32 = vpop.permute.xlu1 %689 }
 0x22d   :  { %648 = vperm.xlu1 %1176, %v622_v16  }
 0x22e   :  { %v1245_v19 = vpop.eup %1244 }
 0x22f   :  { %v623_v20 = vmul.f32 %v1245_v19, %v615_v18 }
 0x230   :  { %v695_v33 = vpop.permute.xlu1 %694 }
 0x231   :  { %653 = vperm.xlu0 %1177, %v623_v20   ;;  %v1052_v20 = vld [vmem:[%s1624_s4 + $0x10] sm:$0xff]  }
 0x232   :  { %v1247_v23 = vpop.eup %1246 }
 0x233   :  { %v624_v24 = vmul.f32 %v1247_v23, %v616_v21 }
 0x234   :  { %v700_v34 = vpop.permute.xlu1 %699 }
 0x235   :  { %658 = vperm.xlu1 %1176, %v624_v24  }
 0x236   :  { %v1249_v26 = vpop.eup %1248 }
 0x237   :  { %v625_v28 = vmul.f32 %v1249_v26, %v617_v25 }
 0x238   :  { %v705_v35 = vpop.permute.xlu1 %704 }
 0x239   :  { %663 = vperm.xlu0 %1177, %v625_v28   ;;  %714 = vperm.xlu1 %1176, %v680_v27   ;;  %v1045_v27 = vunpack.c.l.bf16 %v1052_v20  ;;  %v1046_v28 = vunpack.c.h.bf16 %v1052_v20 }
 0x23d   :  { %719 = vperm.xlu0 %1177, %v681_v29   ;;  %948 = vperm.xlu1 %1176, %v945_v30  }
 0x298   :  { %v629_v36 = vpop.permute.xlu0 %628 }
 0x299   :  { %v666_v37 = vmul.f32 %v629_v36, %v1480_v52 }
 0x29b   :  { %v722_v38 = vadd.f32 %v685_v31, %v666_v37 }
 0x29c   :  { %v634_v39 = vpop.permute.xlu1 %633  ;;  %v710_v55 = vpop.permute.xlu0 %709 }
 0x29d   :  { %v667_v40 = vmul.f32 %v634_v39, %v1485_v56  ;;  %v738_v41 = vmul.f32 0.2, %v722_v38  ;;  %vm730_vm1 = vcmp.ge.f32.partialorder %v722_v38, 0.0 }
 0x29f   :  { %v723_v42 = vadd.f32 %v690_v32, %v667_v40  ;;  %v746_v47 = vsel %vm730_vm1, %v722_v38, %v738_v41  ;;  %v1053_v38 = vld [vmem:[%s1624_s4 + $0x18] sm:$0xff]   ;;  %s1277_s4 = smov [#allocation3]  }
 0x2a0   :  { %v639_v43 = vpop.permute.xlu1 %638  ;;  %s970_s18 = sshll.u32 %s1277_s4, 4  ;;  %s971_s18 = int_to_ptr.vmem [resolvable:$true] %s970_s18 }
 0x2a1   :  { %vm731_vm2 = vcmp.ge.f32.partialorder %v723_v42, 0.0  ;;  %v739_v44 = vmul.f32 0.2, %v723_v42  ;;  %v668_v45 = vmul.f32 %v639_v43, %v1490_v62  ;;  %s1254_s19 = scalar_lea.vmem %s971_s18, 16  ;;  %s1258_s20 = scalar_lea.vmem %s971_s18, 32 }
 0x2a2   :  { %p1255_p0 = scmp.ne.s32.totalorder %s971_s18, %s1254_s19  ;;  %p1259_p1 = scmp.lt.s32.totalorder %s971_s18, %s971_s18 }
 0x2a3   :  { %v747_v48 = vsel %vm731_vm2, %v723_v42, %v739_v44  ;;  %v724_v49 = vadd.f32 %v695_v33, %v668_v45  ;;  %v1050_v42 = vunpack.c.h.bf16 %v1053_v38  ;;  %p1260_p2 = scmp.lt.s32.totalorder %s1258_s20, %s1254_s19 }
 0x2a4   :  { %v754_v52 = vpack.c.bf16 %v747_v48, %v746_v47  ;;  %v644_v50 = vpop.permute.xlu1 %643 }
 0x2a5   :  { %v669_v56 = vmul.f32 %v644_v50, %v1495_v2  ;;  %v740_v59 = vmul.f32 0.2, %v724_v49  ;;  %vm732_vm3 = vcmp.ge.f32.partialorder %v724_v49, 0.0  ;;  %p1261_p3 = por %p1260_p2, %p1259_p1 }
 0x2a6   :  { %v759_v54 = vunpack.c.h.bf16 %v754_v52  ;;  %v758_v57 = vunpack.c.l.bf16 %v754_v52 }
 0x2a7   :  { %v725_v60 = vadd.f32 %v700_v34, %v669_v56  ;;  %v748_v2 = vsel %vm732_vm3, %v724_v49, %v740_v59  ;;  %p1262_p4 = pnand %p1261_p3, %p1255_p0 }
 0x2a8   :  { %v649_v62 = vpop.permute.xlu1 %648  ;;  %v782_v61 = vmul.f32 %v1037_v51, %v758_v57  ;;  %v783_v58 = vmul.f32 %v1038_v53, %v759_v54 }
 0x2a9   :  { %vm733_vm4 = vcmp.ge.f32.partialorder %v725_v60, 0.0  ;;  %v741_v63 = vmul.f32 0.2, %v725_v60  ;;  %v670_v0 = vmul.f32 %v649_v62, %v1500_v7 }
 0x2aa   :  { %1154 = vmatprep.mubr.msk.f32.mxu0 %vm512_vm0, %v782_v61 }
 0x2ab   :  { %v749_v3 = vsel %vm733_vm4, %v725_v60, %v741_v63  ;;  %v726_v4 = vadd.f32 %v705_v35, %v670_v0  ;;  %1155 = vmatmul.mubr.msk.f32.vlgmr.msra.gmra.mxu0 %vm512_vm0, %v783_v58 }
 0x2ac   :  { %v755_v5 = vpack.c.bf16 %v749_v3, %v748_v2  ;;  %v654_v6 = vpop.permute.xlu0 %653 }
 0x2ad   :  { %v671_v10 = vmul.f32 %v654_v6, %v1505_v12  ;;  %v742_v7 = vmul.f32 0.2, %v726_v4  ;;  %vm734_vm5 = vcmp.ge.f32.partialorder %v726_v4, 0.0 }
 0x2ae   :  { %v760_v11 = vunpack.c.l.bf16 %v755_v5  ;;  %v761_v13 = vunpack.c.h.bf16 %v755_v5  ;;  %v951_v5 = vlaneseq }
 0x2af   :  { %v727_v14 = vadd.f32 %v710_v55, %v671_v10  ;;  %v750_v21 = vsel %vm734_vm5, %v726_v4, %v742_v7 }
 0x2b0   :  { %v659_v15 = vpop.permute.xlu1 %658  ;;  %v784_v16 = vmul.f32 %v1041_v8, %v760_v11  ;;  %v785_v18 = vmul.f32 %v1042_v9, %v761_v13  ;;  %v952_v9 = vshrl.u32 %v951_v5, 7 }
 0x2b1   :  { %vm735_vm6 = vcmp.ge.f32.partialorder %v727_v14, 0.0  ;;  %v743_v19 = vmul.f32 0.2, %v727_v14  ;;  %v672_v12 = vmul.f32 %v659_v15, %v1510_v17 }
 0x2b2   :  { %1157 = vmatprep.mubr.msk.f32.mxu0 %vm512_vm0, %v784_v16  ;;  %v953_v13 = vsub.s32 0, %v952_v9 }
 0x2b3   :  { %v751_v23 = vsel %vm735_vm6, %v727_v14, %v743_v19  ;;  %1158 = vmatmul.mubr.msk.f32.gmra.mxu0 %vm512_vm0, %v785_v18 }
 0x2b4   :  { %v756_v24 = vpack.c.bf16 %v751_v23, %v750_v21  ;;  %v715_v25 = vpop.permute.xlu1 %714  ;;  %v664_v26 = vpop.permute.xlu0 %663 }
 0x2b5   :  { %v728_v29 = vadd.f32 %v715_v25, %v672_v12  ;;  %v673_v32 = vmul.f32 %v664_v26, %v1515_v22  ;;  %v1049_v22 = vunpack.c.l.bf16 %v1053_v38 }
 0x2b6   :  { %v763_v30 = vunpack.c.h.bf16 %v756_v24  ;;  %v762_v31 = vunpack.c.l.bf16 %v756_v24 }
 0x2b7   :  { %v744_v36 = vmul.f32 0.2, %v728_v29  ;;  %vm736_vm7 = vcmp.ge.f32.partialorder %v728_v29, 0.0 }
 0x2b8   :  { %v720_v33 = vpop.permute.xlu0 %719  ;;  %v786_v34 = vmul.f32 %v1045_v27, %v762_v31  ;;  %v787_v35 = vmul.f32 %v1046_v28, %v763_v30  ;;  %v949_v14 = vpop.permute.xlu1 %948 }
 0x2b9   :  { %v729_v37 = vadd.f32 %v720_v33, %v673_v32  ;;  %v752_v39 = vsel %vm736_vm7, %v728_v29, %v744_v36  ;;  %v954_v16 = vrot.slane %v949_v14, %v953_v13 }
 0x2ba   :  { %1160 = vmatprep.mubr.msk.f32.mxu1 %vm512_vm0, %v786_v34 }
 0x2bb   :  { %vm737_vm8 = vcmp.ge.f32.partialorder %v729_v37, 0.0  ;;  %v745_v17 = vmul.f32 0.2, %v729_v37  ;;  %1161 = vmatmul.mubr.msk.f32.vlgmr.msra.gmra.mxu1 %vm512_vm0, %v787_v35 }
 0x2bd   :  { %v753_v40 = vsel %vm737_vm8, %v729_v37, %v745_v17 }
 0x2be   :  { %v757_v41 = vpack.c.bf16 %v753_v40, %v752_v39 }
 0x2c0   :  { %v764_v43 = vunpack.c.l.bf16 %v757_v41  ;;  %v765_v44 = vunpack.c.h.bf16 %v757_v41 }
 0x2c2   :  { %v788_v45 = vmul.f32 %v1049_v22, %v764_v43  ;;  %v789_v46 = vmul.f32 %v1050_v42, %v765_v44 }
 0x2c4   :  { %1163 = vmatprep.mubr.msk.f32.mxu1 %vm512_vm0, %v788_v45 }
 0x2c5   :  { %1164 = vmatmul.mubr.msk.f32.gmra.mxu1 %vm512_vm0, %v789_v46 }
 0x36b   :  { %v1156_v47 = vpop.f32.mrf.mxu0 }
 0x36c   :  { %v925_v51 = vsel %vm923_vm9, %v1156_v47, 0.0 }
 0x36d   :  { %v884_v48 = vpop.f32.mrf.mxu0 }
 0x36e   :  { %v924_v50 = vsel %vm923_vm9, %v884_v48, 0.0 }
 0x36f   :  { %v926_v56 = vadd.f32 %v925_v51, %v924_v50 }
 0x373   :  { %v1159_v49 = vpop.f32.mrf.mxu0 }
 0x374   :  { %v929_v59 = vsel %vm923_vm9, %v1159_v49, 0.0 }
 0x375   :  { %v894_v52 = vpop.f32.mrf.mxu0 }
 0x376   :  { %v927_v53 = vsel %vm923_vm9, %v894_v52, 0.0 }
 0x377   :  { %v928_v55 = vadd.f32 %v927_v53, %v926_v56 }
 0x379   :  { %v930_v62 = vadd.f32 %v929_v59, %v928_v55 }
 0x37b   :  { %v1162_v54 = vpop.f32.mrf.mxu1 }
 0x37c   :  { %v933_v63 = vsel %vm923_vm9, %v1162_v54, 0.0 }
 0x37d   :  { %v904_v57 = vpop.f32.mrf.mxu1 }
 0x37e   :  { %v931_v60 = vsel %vm923_vm9, %v904_v57, 0.0 }
 0x37f   :  { %v932_v61 = vadd.f32 %v931_v60, %v930_v62 }
 0x381   :  { %v934_v1 = vadd.f32 %v933_v63, %v932_v61 }
 0x385   :  { %v1165_v58 = vpop.f32.mrf.mxu1 }
 0x386   :  { %v937_v4 = vsel %vm923_vm9, %v1165_v58, 0.0 }
 0x387   :  { %v914_v0 = vpop.f32.mrf.mxu1 }
 0x388   :  { %v935_v2 = vsel %vm923_vm9, %v914_v0, 0.0 }
 0x389   :  { %v936_v3 = vadd.f32 %v935_v2, %v934_v1 }
 0x38b   :  { %v938_v6 = vadd.f32 %v937_v4, %v936_v3 }
 0x38d   :  { %v939_v8 = vrot.slane %v938_v6, 4 }
 0x38f   :  { %v940_v10 = vadd.f32 %v939_v8, %v938_v6 }
 0x391   :  { %v941_v11 = vrot.slane %v940_v10, 2 }
 0x393   :  { %v942_v7 = vadd.f32 %v941_v11, %v940_v10 }
 0x395   :  { %v943_v15 = vrot.slane %v942_v7, 1 }
 0x397   :  { %v944_v18 = vadd.f32 %v943_v15, %v942_v7 }
 0x399   :  { %v955_v19 = vadd.f32 %v954_v16, %v944_v18 }
 0x39b   :  { %v1034_v20 = vmul.f32 -1.442695, %v955_v19 }
 0x39d   :  { %1250 = vpow2.f32 %v1034_v20 }
 0x3aa   :  { %v1251_v21 = vpop.eup %1250 }
 0x3ab   :  { %v959_v23 = vadd.f32 1.0, %v1251_v21 }
 0x3ad   :  { %1252 = vrcp.f32 %v959_v23 }
 0x3ba   :  { %v1253_v12 = vpop.eup %1252 }
 0x3bb   :  { %963 = vst.msk [vmem:[#allocation3] sm:$0x1] %vm962_vm10, %v1253_v12 }
 0x3bc   :  { %1265 = shalt.err (!%p1262_p4)
}
 0x3bd   :  { %973 = dma.vmem_to_hbm [thread:$0]  %s971_s18, 16, %s1627_s7, [#allocation4]  }
 0x3be   :  { %1274 = dma.done.wait [#allocation4], 16  }
 0x3bf   :  { %1275 = vsyncadd [#allocation4], 4294967280 }
 0x3c0   :  { %977 = vsyncpa [#allocation4], 1 }

</bundles_post_ra>
